<compile_context>
chip_gen: v6e
topology: v6e:2x2x1
jax: 0.10.0
libtpu: 0.0.40
codegen_flags: <defaults>
</compile_context>

<pallas_src>
import functools
import numpy as np
import jax
import jax.numpy as jnp
from jax.experimental import pallas as pl
from jax.experimental.pallas import tpu as pltpu

CHANNELS = 8                     # ParamNet "channels" (hidden width of dynamic 1x1 convs)
LAYERS = 2
CLASS_NUM = 7 * CHANNELS + 3     # 59 predicted weights per sample
CPAD = 128                       # class dim padded to a lane-dense 128
RESAMPLE = 32                    # small resample_size for testing (module default 128)
PARAM = 1.0                      # self.param init
DATA_RANGE = 4.5                 # self.data_range init
CONV_CHUNK = 2048                # lane chunk for the dynamic-conv stage


def _bilinear_matrix(out_size, in_size):
    """Row matrix A such that A @ v == 1-D bilinear resize with align_corners=True."""
    if out_size == 1:
        A = np.zeros((1, in_size), np.float32)
        A[0, 0] = 1.0
        return A
    src = np.arange(out_size, dtype=np.float64) * (in_size - 1) / (out_size - 1)
    i0 = np.clip(np.floor(src).astype(np.int64), 0, in_size - 1)
    i1 = np.clip(i0 + 1, 0, in_size - 1)
    frac = (src - i0).astype(np.float32)
    A = np.zeros((out_size, in_size), np.float32)
    A[np.arange(out_size), i0] += 1.0 - frac
    A[np.arange(out_size), i1] += frac
    return A


# ------------------------------ fused kernel -------------------------------

def fused_paramnet_kernel(xb_ref, xc_ref, wfold_ref, bias_ref, o_ref, *,
                          data_range, param, channels, batch_tile, conv_chunk):
    ch = channels
    bt = batch_tile
    hwp = o_ref.shape[-1]
    n_chunks = hwp // conv_chunk

    # ---- 1) + 2) folded bilinear resample + backbone head (one fat MXU dot) ----
    # TODO(synk): the external ResNet-18 backbone (`res` module, not provided) is
    # replaced by a deterministic linear head; the bilinear interpolation is folded
    # into that head on the host, so steps 1+2 become a single (bt, 3*HWp) @
    # (3*HWp, 128) matmul with M = batch_tile.
    acc = bias_ref[...] + jnp.dot(xb_ref[...], wfold_ref[...],
                                  preferred_element_type=jnp.float32)   # (bt, 128)
    ow = data_range * jnp.tanh(acc)          # lanes >= 59 are zero padding (never read)

    # ---- 3) per-sample dynamic 1x1 convs ---------------------------------------
    lane_ch = jax.lax.broadcasted_iota(jnp.int32, (ch, CPAD), 1)
    sub_ch = jax.lax.broadcasted_iota(jnp.int32, (ch, CPAD), 0)
    lane_3 = jax.lax.broadcasted_iota(jnp.int32, (3, CPAD), 1)
    sub_3 = jax.lax.broadcasted_iota(jnp.int32, (3, CPAD), 0)

    for b in range(bt):                       # static unroll, bt <= 8
        ow_b = ow[b:b + 1, :]                 # (1, 128)

        # Unpack the 59 per-sample conv params once per sample (lane-masked reduces).
        b1 = jnp.sum(jnp.where(lane_ch == 3 * ch + sub_ch, ow_b, 0.0),
                     axis=1, keepdims=True)                              # (ch, 1)
        w1 = [jnp.sum(jnp.where(lane_ch == 3 * sub_ch + c, ow_b, 0.0),
                      axis=1, keepdims=True) for c in range(3)]          # 3 x (ch, 1)
        b2 = jnp.sum(jnp.where(lane_3 == 7 * ch + sub_3, ow_b, 0.0),
                     axis=1, keepdims=True)                              # (3, 1)
        w2 = [jnp.sum(jnp.where(lane_3 == 4 * ch + ch * sub_3 + k, ow_b, 0.0),
                      axis=1, keepdims=True) for k in range(ch)]         # ch x (3, 1)

        # conv1 -> relu -> conv2 (+ residual, tanh), processed in lane chunks so the
        # (ch, chunk) working set stays in vregs instead of spilling to VMEM.
        for j in range(n_chunks):
            lo = j * conv_chunk
            xs = xc_ref[b, :, lo:lo + conv_chunk]                        # (3, chunk)
            h = b1
            for c in range(3):                                           # VPU FMAs
                h = h + w1[c] * xs[c:c + 1, :]                           # (ch, chunk)
            h = jnp.maximum(h, 0.0)                                      # F.relu
            y = b2
            for k in range(ch):                                          # VPU FMAs (no XLU reduce)
                y = y + w2[k] * h[k:k + 1, :]                            # (3, chunk)
            # one fused (3, chunk) store per (sample, chunk)
            o_ref[b, :, lo:lo + conv_chunk] = jnp.tanh(y + param * xs)


# ------------------------------- wrapper ------------------------------------

def paramnet_forward(x, w_fc, b_fc, *, batch_tile=None):
    B, C, H, W = x.shape
    assert C == 3
    R, ch = RESAMPLE, CHANNELS
    HW = H * W

    # Lane-dense pixel dim; if HW is large, round up to a multiple of CONV_CHUNK so
    # the in-kernel conv chunk loop uses aligned, unmasked slices.
    if HW <= CONV_CHUNK:
        HWp = ((HW + 127) // 128) * 128
        chunk = HWp
    else:
        HWp = ((HW + CONV_CHUNK - 1) // CONV_CHUNK) * CONV_CHUNK
        chunk = CONV_CHUNK

    # Batch tile: bt samples per grid step (fattens MXU M). bt is either == B or a
    # multiple of 8, keeping the sublane dim of the flat LHS block legal.
    bt = batch_tile if batch_tile is not None else min(B, 8)
    Bp = ((B + bt - 1) // bt) * bt

    hp = jax.lax.Precision.HIGHEST

    # Fold the bilinear resample (align_corners=True) into the linear head,
    # separably (no Kronecker matrix is ever materialized):
    #   wfold[c, h*W+w, j] = sum_{r,s} ah[r,h] * aw[s,w] * w_fc[c*R*R + r*R + s, j]
    ah = jnp.asarray(_bilinear_matrix(R, H))                 # (R, H)
    aw = jnp.asarray(_bilinear_matrix(R, W))                 # (R, W)
    w4 = w_fc.reshape(3, R, R, CLASS_NUM)
    wfold = jnp.einsum('rh,sw,crsj->chwj', ah, aw, w4, precision=hp)
    wfold = wfold.reshape(3, HW, CLASS_NUM)
    wfold = jnp.pad(wfold, ((0, 0), (0, HWp - HW), (0, CPAD - CLASS_NUM)))
    wfold2d = wfold.reshape(3 * HWp, CPAD)                   # row index = c*HWp + p

    bias = jnp.pad(b_fc.reshape(1, CLASS_NUM), ((0, 0), (0, CPAD - CLASS_NUM)))

    # Two x views: (Bp, 3, HWp) for the conv/residual stage, (Bp, 3*HWp) flat for
    # the backbone MXU LHS (same memory order as wfold2d rows).
    x_conv = jnp.pad(x.reshape(B, 3, HW), ((0, Bp - B), (0, 0), (0, HWp - HW)))
    x_bk = x_conv.reshape(Bp, 3 * HWp)

    flops = 2 * Bp * (3 * HWp) * CPAD + 2 * Bp * 2 * 3 * ch * HWp
    transc = Bp * (CPAD + 3 * HWp)
    bytes_acc = 4 * (x_bk.size + x_conv.size + wfold2d.size + bias.size + Bp * 3 * HWp)

    y = pl.pallas_call(
        functools.partial(fused_paramnet_kernel, data_range=DATA_RANGE, param=PARAM,
                          channels=ch, batch_tile=bt, conv_chunk=chunk),
        out_shape=jax.ShapeDtypeStruct((Bp, 3, HWp), jnp.float32),
        grid=(Bp // bt,),
        in_specs=[
            pl.BlockSpec((bt, 3 * HWp), lambda i: (i, 0)),       # backbone LHS view
            pl.BlockSpec((bt, 3, HWp), lambda i: (i, 0, 0)),     # conv/residual view
            # Resident operands: whole-array VMEM, DMA'd once, single-buffered
            # (no constant-index BlockSpec double buffering).
            pl.BlockSpec(memory_space=pltpu.MemorySpace.VMEM),   # folded head weights
            pl.BlockSpec(memory_space=pltpu.MemorySpace.VMEM),   # head bias
        ],
        out_specs=pl.BlockSpec((bt, 3, HWp), lambda i: (i, 0, 0)),
        compiler_params=pltpu.CompilerParams(
            dimension_semantics=("parallel",),      # batch tiles split across v7x's 2 TCs
            # <= ~60 MiB fits every generation (v7x physical VMEM is 64 MiB);
            # raise toward ~110 MiB on v5e/v6e for production tilings.
            vmem_limit_bytes=60 * 1024 * 1024),
        cost_estimate=pl.CostEstimate(flops=int(flops), transcendentals=int(transc),
                                      bytes_accessed=int(bytes_acc)),
    )(x_bk, x_conv, wfold2d, bias)

    return y[:B, :, :HW].reshape(B, 3, H, W)


# --------------------------- pure-JAX reference -----------------------------

def ref_forward(x, w_fc, b_fc):
    B, C, H, W = x.shape
    R, ch = RESAMPLE, CHANNELS
    hp = jax.lax.Precision.HIGHEST
    ah = jnp.asarray(_bilinear_matrix(R, H))
    aw = jnp.asarray(_bilinear_matrix(R, W))
    x_rs = jnp.einsum('rh,bchw,sw->bcrs', ah, x, aw, precision=hp)
    ow = DATA_RANGE * jnp.tanh(jnp.matmul(x_rs.reshape(B, -1), w_fc, precision=hp) + b_fc)
    w1 = ow[:, :3 * ch].reshape(B, ch, 3)
    b1 = ow[:, 3 * ch:4 * ch].reshape(B, ch, 1)
    w2 = ow[:, 4 * ch:7 * ch].reshape(B, 3, ch)
    b2 = ow[:, 7 * ch:7 * ch + 3].reshape(B, 3, 1)
    xf = x.reshape(B, 3, H * W)
    h = jnp.maximum(jnp.einsum('bki,bip->bkp', w1, xf, precision=hp) + b1, 0.0)
    y = jnp.einsum('bok,bkp->bop', w2, h, precision=hp) + b2
    return jnp.tanh(y + PARAM * xf).reshape(B, 3, H, W)


if __name__ == "__main__":
    key = jax.random.PRNGKey(0)
    kx, kw = jax.random.split(key)
    B, H, W = 2, 16, 16
    x = jax.random.normal(kx, (B, 3, H, W), dtype=jnp.float32)

    # deterministic backbone-head parameters (linear stand-in for ResNet-18)
    Fdim = 3 * RESAMPLE * RESAMPLE
    w_fc = 0.02 * jax.random.normal(kw, (Fdim, CLASS_NUM), dtype=jnp.float32)
    b_fc = jnp.zeros((1, CLASS_NUM), dtype=jnp.float32)

    out = jax.block_until_ready(paramnet_forward(x, w_fc, b_fc))
    ref = jax.block_until_ready(ref_forward(x, w_fc, b_fc))

    assert out.shape == (B, 3, H, W)
    np.testing.assert_allclose(np.asarray(out), np.asarray(ref), atol=1e-4, rtol=1e-4)

    print("KERNEL_OK")
</pallas_src>

<mosaic_0001>
module attributes {stable_mosaic.version = 11 : i64} {
  func.func @fused_paramnet_kernel(%arg0: i32, %arg1: memref<2x768xf32, #tpu.memory_space<vmem>>, %arg2: memref<2x3x256xf32, #tpu.memory_space<vmem>>, %arg3: memref<768x128xf32, #tpu.memory_space<vmem>>, %arg4: memref<1x128xf32, #tpu.memory_space<vmem>>, %arg5: memref<2x3x256xf32, #tpu.memory_space<vmem>>) attributes {dimension_semantics = [#tpu.dimension_semantics<parallel>], iteration_bounds = array<i64: 1>, scalar_prefetch = 0 : i64, scratch_operands = 0 : i64, tpu.core_type = #tpu.core_type<tc>, window_params = [{transform_indices = @transform_0, window_bounds = array<i64: 2, 768>}, {transform_indices = @transform_1, window_bounds = array<i64: 2, 3, 256>}, {pipeline_mode = #tpu.pipeline_mode<synchronous>, transform_indices = @transform_2, window_bounds = array<i64: 768, 128>}, {pipeline_mode = #tpu.pipeline_mode<synchronous>, transform_indices = @transform_3, window_bounds = array<i64: 1, 128>}, {transform_indices = @transform_4, window_bounds = array<i64: 2, 3, 256>}]} {
    %c0 = arith.constant 0 : index
    %c0_0 = arith.constant 0 : index
    %0 = vector.load %arg4[%c0, %c0_0] : memref<1x128xf32, #tpu.memory_space<vmem>>, vector<1x128xf32>
    %c0_1 = arith.constant 0 : index
    %c0_2 = arith.constant 0 : index
    %1 = vector.load %arg1[%c0_1, %c0_2] : memref<2x768xf32, #tpu.memory_space<vmem>>, vector<2x768xf32>
    %c0_3 = arith.constant 0 : index
    %c0_4 = arith.constant 0 : index
    %2 = vector.load %arg3[%c0_3, %c0_4] : memref<768x128xf32, #tpu.memory_space<vmem>>, vector<768x128xf32>
    %cst = arith.constant dense<0.000000e+00> : vector<2x128xf32>
    %3 = tpu.matmul %1, %2, %cst {dimension_numbers = #tpu.dot_dimension_numbers<[1], [0], [0], [1], [0, 0, 1, 1], [], []>} : vector<2x768xf32>, vector<768x128xf32>, vector<2x128xf32> -> vector<2x128xf32>
    %4 = vector.broadcast %0 : vector<1x128xf32> to vector<2x128xf32>
    %5 = arith.addf %4, %3 : vector<2x128xf32>
    %6 = math.tanh %5 : vector<2x128xf32>
    %cst_5 = arith.constant 4.500000e+00 : f32
    %7 = vector.broadcast %cst_5 : f32 to vector<2x128xf32>
    %8 = arith.mulf %7, %6 : vector<2x128xf32>
    %9 = tpu.iota {dimensions = array<i32: 1>} : vector<8x128xi32>
    %10 = tpu.iota {dimensions = array<i32: 0>} : vector<8x128xi32>
    %11 = tpu.iota {dimensions = array<i32: 1>} : vector<3x128xi32>
    %12 = tpu.iota {dimensions = array<i32: 0>} : vector<3x128xi32>
    %13 = vector.extract_strided_slice %8 {offsets = [0, 0], sizes = [1, 128], strides = [1, 1]} : vector<2x128xf32> to vector<1x128xf32>
    %c24_i32 = arith.constant 24 : i32
    %14 = vector.broadcast %c24_i32 : i32 to vector<8x128xi32>
    %15 = arith.addi %14, %10 : vector<8x128xi32>
    %16 = arith.cmpi eq, %9, %15 : vector<8x128xi32>
    %cst_6 = arith.constant 0.000000e+00 : f32
    %17 = vector.shape_cast %13 : vector<1x128xf32> to vector<1x128xf32>
    %18 = vector.broadcast %17 : vector<1x128xf32> to vector<8x128xf32>
    %19 = vector.broadcast %cst_6 : f32 to vector<8x128xf32>
    %20 = arith.select %16, %18, %19 : vector<8x128xi1>, vector<8x128xf32>
    %cst_7 = arith.constant dense<0.000000e+00> : vector<8xf32>
    %21 = vector.multi_reduction <add>, %20, %cst_7 [1] : vector<8x128xf32> to vector<8xf32>
    %22 = vector.shape_cast %21 : vector<8xf32> to vector<8x1xf32>
    %c3_i32 = arith.constant 3 : i32
    %23 = vector.broadcast %c3_i32 : i32 to vector<8x128xi32>
    %24 = arith.muli %23, %10 : vector<8x128xi32>
    %c0_i32 = arith.constant 0 : i32
    %25 = vector.broadcast %c0_i32 : i32 to vector<8x128xi32>
    %26 = arith.addi %24, %25 : vector<8x128xi32>
    %27 = arith.cmpi eq, %9, %26 : vector<8x128xi32>
    %cst_8 = arith.constant 0.000000e+00 : f32
    %28 = vector.shape_cast %13 : vector<1x128xf32> to vector<1x128xf32>
    %29 = vector.broadcast %28 : vector<1x128xf32> to vector<8x128xf32>
    %30 = vector.broadcast %cst_8 : f32 to vector<8x128xf32>
    %31 = arith.select %27, %29, %30 : vector<8x128xi1>, vector<8x128xf32>
    %cst_9 = arith.constant dense<0.000000e+00> : vector<8xf32>
    %32 = vector.multi_reduction <add>, %31, %cst_9 [1] : vector<8x128xf32> to vector<8xf32>
    %33 = vector.shape_cast %32 : vector<8xf32> to vector<8x1xf32>
    %c3_i32_10 = arith.constant 3 : i32
    %34 = vector.broadcast %c3_i32_10 : i32 to vector<8x128xi32>
    %35 = arith.muli %34, %10 : vector<8x128xi32>
    %c1_i32 = arith.constant 1 : i32
    %36 = vector.broadcast %c1_i32 : i32 to vector<8x128xi32>
    %37 = arith.addi %35, %36 : vector<8x128xi32>
    %38 = arith.cmpi eq, %9, %37 : vector<8x128xi32>
    %cst_11 = arith.constant 0.000000e+00 : f32
    %39 = vector.shape_cast %13 : vector<1x128xf32> to vector<1x128xf32>
    %40 = vector.broadcast %39 : vector<1x128xf32> to vector<8x128xf32>
    %41 = vector.broadcast %cst_11 : f32 to vector<8x128xf32>
    %42 = arith.select %38, %40, %41 : vector<8x128xi1>, vector<8x128xf32>
    %cst_12 = arith.constant dense<0.000000e+00> : vector<8xf32>
    %43 = vector.multi_reduction <add>, %42, %cst_12 [1] : vector<8x128xf32> to vector<8xf32>
    %44 = vector.shape_cast %43 : vector<8xf32> to vector<8x1xf32>
    %c3_i32_13 = arith.constant 3 : i32
    %45 = vector.broadcast %c3_i32_13 : i32 to vector<8x128xi32>
    %46 = arith.muli %45, %10 : vector<8x128xi32>
    %c2_i32 = arith.constant 2 : i32
    %47 = vector.broadcast %c2_i32 : i32 to vector<8x128xi32>
    %48 = arith.addi %46, %47 : vector<8x128xi32>
    %49 = arith.cmpi eq, %9, %48 : vector<8x128xi32>
    %cst_14 = arith.constant 0.000000e+00 : f32
    %50 = vector.shape_cast %13 : vector<1x128xf32> to vector<1x128xf32>
    %51 = vector.broadcast %50 : vector<1x128xf32> to vector<8x128xf32>
    %52 = vector.broadcast %cst_14 : f32 to vector<8x128xf32>
    %53 = arith.select %49, %51, %52 : vector<8x128xi1>, vector<8x128xf32>
    %cst_15 = arith.constant dense<0.000000e+00> : vector<8xf32>
    %54 = vector.multi_reduction <add>, %53, %cst_15 [1] : vector<8x128xf32> to vector<8xf32>
    %55 = vector.shape_cast %54 : vector<8xf32> to vector<8x1xf32>
    %c56_i32 = arith.constant 56 : i32
    %56 = vector.broadcast %c56_i32 : i32 to vector<3x128xi32>
    %57 = arith.addi %56, %12 : vector<3x128xi32>
    %58 = arith.cmpi eq, %11, %57 : vector<3x128xi32>
    %cst_16 = arith.constant 0.000000e+00 : f32
    %59 = vector.shape_cast %13 : vector<1x128xf32> to vector<1x128xf32>
    %60 = vector.broadcast %59 : vector<1x128xf32> to vector<3x128xf32>
    %61 = vector.broadcast %cst_16 : f32 to vector<3x128xf32>
    %62 = arith.select %58, %60, %61 : vector<3x128xi1>, vector<3x128xf32>
    %cst_17 = arith.constant dense<0.000000e+00> : vector<3xf32>
    %63 = vector.multi_reduction <add>, %62, %cst_17 [1] : vector<3x128xf32> to vector<3xf32>
    %64 = vector.shape_cast %63 : vector<3xf32> to vector<3x1xf32>
    %c8_i32 = arith.constant 8 : i32
    %65 = vector.broadcast %c8_i32 : i32 to vector<3x128xi32>
    %66 = arith.muli %65, %12 : vector<3x128xi32>
    %c32_i32 = arith.constant 32 : i32
    %67 = vector.broadcast %c32_i32 : i32 to vector<3x128xi32>
    %68 = arith.addi %67, %66 : vector<3x128xi32>
    %c0_i32_18 = arith.constant 0 : i32
    %69 = vector.broadcast %c0_i32_18 : i32 to vector<3x128xi32>
    %70 = arith.addi %68, %69 : vector<3x128xi32>
    %71 = arith.cmpi eq, %11, %70 : vector<3x128xi32>
    %cst_19 = arith.constant 0.000000e+00 : f32
    %72 = vector.shape_cast %13 : vector<1x128xf32> to vector<1x128xf32>
    %73 = vector.broadcast %72 : vector<1x128xf32> to vector<3x128xf32>
    %74 = vector.broadcast %cst_19 : f32 to vector<3x128xf32>
    %75 = arith.select %71, %73, %74 : vector<3x128xi1>, vector<3x128xf32>
    %cst_20 = arith.constant dense<0.000000e+00> : vector<3xf32>
    %76 = vector.multi_reduction <add>, %75, %cst_20 [1] : vector<3x128xf32> to vector<3xf32>
    %77 = vector.shape_cast %76 : vector<3xf32> to vector<3x1xf32>
    %c8_i32_21 = arith.constant 8 : i32
    %78 = vector.broadcast %c8_i32_21 : i32 to vector<3x128xi32>
    %79 = arith.muli %78, %12 : vector<3x128xi32>
    %c32_i32_22 = arith.constant 32 : i32
    %80 = vector.broadcast %c32_i32_22 : i32 to vector<3x128xi32>
    %81 = arith.addi %80, %79 : vector<3x128xi32>
    %c1_i32_23 = arith.constant 1 : i32
    %82 = vector.broadcast %c1_i32_23 : i32 to vector<3x128xi32>
    %83 = arith.addi %81, %82 : vector<3x128xi32>
    %84 = arith.cmpi eq, %11, %83 : vector<3x128xi32>
    %cst_24 = arith.constant 0.000000e+00 : f32
    %85 = vector.shape_cast %13 : vector<1x128xf32> to vector<1x128xf32>
    %86 = vector.broadcast %85 : vector<1x128xf32> to vector<3x128xf32>
    %87 = vector.broadcast %cst_24 : f32 to vector<3x128xf32>
    %88 = arith.select %84, %86, %87 : vector<3x128xi1>, vector<3x128xf32>
    %cst_25 = arith.constant dense<0.000000e+00> : vector<3xf32>
    %89 = vector.multi_reduction <add>, %88, %cst_25 [1] : vector<3x128xf32> to vector<3xf32>
    %90 = vector.shape_cast %89 : vector<3xf32> to vector<3x1xf32>
    %c8_i32_26 = arith.constant 8 : i32
    %91 = vector.broadcast %c8_i32_26 : i32 to vector<3x128xi32>
    %92 = arith.muli %91, %12 : vector<3x128xi32>
    %c32_i32_27 = arith.constant 32 : i32
    %93 = vector.broadcast %c32_i32_27 : i32 to vector<3x128xi32>
    %94 = arith.addi %93, %92 : vector<3x128xi32>
    %c2_i32_28 = arith.constant 2 : i32
    %95 = vector.broadcast %c2_i32_28 : i32 to vector<3x128xi32>
    %96 = arith.addi %94, %95 : vector<3x128xi32>
    %97 = arith.cmpi eq, %11, %96 : vector<3x128xi32>
    %cst_29 = arith.constant 0.000000e+00 : f32
    %98 = vector.shape_cast %13 : vector<1x128xf32> to vector<1x128xf32>
    %99 = vector.broadcast %98 : vector<1x128xf32> to vector<3x128xf32>
    %100 = vector.broadcast %cst_29 : f32 to vector<3x128xf32>
    %101 = arith.select %97, %99, %100 : vector<3x128xi1>, vector<3x128xf32>
    %cst_30 = arith.constant dense<0.000000e+00> : vector<3xf32>
    %102 = vector.multi_reduction <add>, %101, %cst_30 [1] : vector<3x128xf32> to vector<3xf32>
    %103 = vector.shape_cast %102 : vector<3xf32> to vector<3x1xf32>
    %c8_i32_31 = arith.constant 8 : i32
    %104 = vector.broadcast %c8_i32_31 : i32 to vector<3x128xi32>
    %105 = arith.muli %104, %12 : vector<3x128xi32>
    %c32_i32_32 = arith.constant 32 : i32
    %106 = vector.broadcast %c32_i32_32 : i32 to vector<3x128xi32>
    %107 = arith.addi %106, %105 : vector<3x128xi32>
    %c3_i32_33 = arith.constant 3 : i32
    %108 = vector.broadcast %c3_i32_33 : i32 to vector<3x128xi32>
    %109 = arith.addi %107, %108 : vector<3x128xi32>
    %110 = arith.cmpi eq, %11, %109 : vector<3x128xi32>
    %cst_34 = arith.constant 0.000000e+00 : f32
    %111 = vector.shape_cast %13 : vector<1x128xf32> to vector<1x128xf32>
    %112 = vector.broadcast %111 : vector<1x128xf32> to vector<3x128xf32>
    %113 = vector.broadcast %cst_34 : f32 to vector<3x128xf32>
    %114 = arith.select %110, %112, %113 : vector<3x128xi1>, vector<3x128xf32>
    %cst_35 = arith.constant dense<0.000000e+00> : vector<3xf32>
    %115 = vector.multi_reduction <add>, %114, %cst_35 [1] : vector<3x128xf32> to vector<3xf32>
    %116 = vector.shape_cast %115 : vector<3xf32> to vector<3x1xf32>
    %c8_i32_36 = arith.constant 8 : i32
    %117 = vector.broadcast %c8_i32_36 : i32 to vector<3x128xi32>
    %118 = arith.muli %117, %12 : vector<3x128xi32>
    %c32_i32_37 = arith.constant 32 : i32
    %119 = vector.broadcast %c32_i32_37 : i32 to vector<3x128xi32>
    %120 = arith.addi %119, %118 : vector<3x128xi32>
    %c4_i32 = arith.constant 4 : i32
    %121 = vector.broadcast %c4_i32 : i32 to vector<3x128xi32>
    %122 = arith.addi %120, %121 : vector<3x128xi32>
    %123 = arith.cmpi eq, %11, %122 : vector<3x128xi32>
    %cst_38 = arith.constant 0.000000e+00 : f32
    %124 = vector.shape_cast %13 : vector<1x128xf32> to vector<1x128xf32>
    %125 = vector.broadcast %124 : vector<1x128xf32> to vector<3x128xf32>
    %126 = vector.broadcast %cst_38 : f32 to vector<3x128xf32>
    %127 = arith.select %123, %125, %126 : vector<3x128xi1>, vector<3x128xf32>
    %cst_39 = arith.constant dense<0.000000e+00> : vector<3xf32>
    %128 = vector.multi_reduction <add>, %127, %cst_39 [1] : vector<3x128xf32> to vector<3xf32>
    %129 = vector.shape_cast %128 : vector<3xf32> to vector<3x1xf32>
    %c8_i32_40 = arith.constant 8 : i32
    %130 = vector.broadcast %c8_i32_40 : i32 to vector<3x128xi32>
    %131 = arith.muli %130, %12 : vector<3x128xi32>
    %c32_i32_41 = arith.constant 32 : i32
    %132 = vector.broadcast %c32_i32_41 : i32 to vector<3x128xi32>
    %133 = arith.addi %132, %131 : vector<3x128xi32>
    %c5_i32 = arith.constant 5 : i32
    %134 = vector.broadcast %c5_i32 : i32 to vector<3x128xi32>
    %135 = arith.addi %133, %134 : vector<3x128xi32>
    %136 = arith.cmpi eq, %11, %135 : vector<3x128xi32>
    %cst_42 = arith.constant 0.000000e+00 : f32
    %137 = vector.shape_cast %13 : vector<1x128xf32> to vector<1x128xf32>
    %138 = vector.broadcast %137 : vector<1x128xf32> to vector<3x128xf32>
    %139 = vector.broadcast %cst_42 : f32 to vector<3x128xf32>
    %140 = arith.select %136, %138, %139 : vector<3x128xi1>, vector<3x128xf32>
    %cst_43 = arith.constant dense<0.000000e+00> : vector<3xf32>
    %141 = vector.multi_reduction <add>, %140, %cst_43 [1] : vector<3x128xf32> to vector<3xf32>
    %142 = vector.shape_cast %141 : vector<3xf32> to vector<3x1xf32>
    %c8_i32_44 = arith.constant 8 : i32
    %143 = vector.broadcast %c8_i32_44 : i32 to vector<3x128xi32>
    %144 = arith.muli %143, %12 : vector<3x128xi32>
    %c32_i32_45 = arith.constant 32 : i32
    %145 = vector.broadcast %c32_i32_45 : i32 to vector<3x128xi32>
    %146 = arith.addi %145, %144 : vector<3x128xi32>
    %c6_i32 = arith.constant 6 : i32
    %147 = vector.broadcast %c6_i32 : i32 to vector<3x128xi32>
    %148 = arith.addi %146, %147 : vector<3x128xi32>
    %149 = arith.cmpi eq, %11, %148 : vector<3x128xi32>
    %cst_46 = arith.constant 0.000000e+00 : f32
    %150 = vector.shape_cast %13 : vector<1x128xf32> to vector<1x128xf32>
    %151 = vector.broadcast %150 : vector<1x128xf32> to vector<3x128xf32>
    %152 = vector.broadcast %cst_46 : f32 to vector<3x128xf32>
    %153 = arith.select %149, %151, %152 : vector<3x128xi1>, vector<3x128xf32>
    %cst_47 = arith.constant dense<0.000000e+00> : vector<3xf32>
    %154 = vector.multi_reduction <add>, %153, %cst_47 [1] : vector<3x128xf32> to vector<3xf32>
    %155 = vector.shape_cast %154 : vector<3xf32> to vector<3x1xf32>
    %c8_i32_48 = arith.constant 8 : i32
    %156 = vector.broadcast %c8_i32_48 : i32 to vector<3x128xi32>
    %157 = arith.muli %156, %12 : vector<3x128xi32>
    %c32_i32_49 = arith.constant 32 : i32
    %158 = vector.broadcast %c32_i32_49 : i32 to vector<3x128xi32>
    %159 = arith.addi %158, %157 : vector<3x128xi32>
    %c7_i32 = arith.constant 7 : i32
    %160 = vector.broadcast %c7_i32 : i32 to vector<3x128xi32>
    %161 = arith.addi %159, %160 : vector<3x128xi32>
    %162 = arith.cmpi eq, %11, %161 : vector<3x128xi32>
    %cst_50 = arith.constant 0.000000e+00 : f32
    %163 = vector.shape_cast %13 : vector<1x128xf32> to vector<1x128xf32>
    %164 = vector.broadcast %163 : vector<1x128xf32> to vector<3x128xf32>
    %165 = vector.broadcast %cst_50 : f32 to vector<3x128xf32>
    %166 = arith.select %162, %164, %165 : vector<3x128xi1>, vector<3x128xf32>
    %cst_51 = arith.constant dense<0.000000e+00> : vector<3xf32>
    %167 = vector.multi_reduction <add>, %166, %cst_51 [1] : vector<3x128xf32> to vector<3xf32>
    %168 = vector.shape_cast %167 : vector<3xf32> to vector<3x1xf32>
    %c0_52 = arith.constant 0 : index
    %c0_53 = arith.constant 0 : index
    %c0_54 = arith.constant 0 : index
    %169 = vector.load %arg2[%c0_52, %c0_53, %c0_54] : memref<2x3x256xf32, #tpu.memory_space<vmem>>, vector<1x3x256xf32>
    %170 = vector.shape_cast %169 : vector<1x3x256xf32> to vector<3x256xf32>
    %171 = vector.extract_strided_slice %170 {offsets = [0, 0], sizes = [1, 256], strides = [1, 1]} : vector<3x256xf32> to vector<1x256xf32>
    %172 = vector.broadcast %33 : vector<8x1xf32> to vector<8x256xf32>
    %173 = vector.broadcast %171 : vector<1x256xf32> to vector<8x256xf32>
    %174 = arith.mulf %172, %173 : vector<8x256xf32>
    %175 = vector.broadcast %22 : vector<8x1xf32> to vector<8x256xf32>
    %176 = arith.addf %175, %174 : vector<8x256xf32>
    %177 = vector.extract_strided_slice %170 {offsets = [1, 0], sizes = [1, 256], strides = [1, 1]} : vector<3x256xf32> to vector<1x256xf32>
    %178 = vector.broadcast %44 : vector<8x1xf32> to vector<8x256xf32>
    %179 = vector.broadcast %177 : vector<1x256xf32> to vector<8x256xf32>
    %180 = arith.mulf %178, %179 : vector<8x256xf32>
    %181 = arith.addf %176, %180 : vector<8x256xf32>
    %182 = vector.extract_strided_slice %170 {offsets = [2, 0], sizes = [1, 256], strides = [1, 1]} : vector<3x256xf32> to vector<1x256xf32>
    %183 = vector.broadcast %55 : vector<8x1xf32> to vector<8x256xf32>
    %184 = vector.broadcast %182 : vector<1x256xf32> to vector<8x256xf32>
    %185 = arith.mulf %183, %184 : vector<8x256xf32>
    %186 = arith.addf %181, %185 : vector<8x256xf32>
    %cst_55 = arith.constant 0.000000e+00 : f32
    %187 = vector.broadcast %cst_55 : f32 to vector<8x256xf32>
    %188 = arith.maximumf %186, %187 : vector<8x256xf32>
    %189 = vector.extract_strided_slice %188 {offsets = [0, 0], sizes = [1, 256], strides = [1, 1]} : vector<8x256xf32> to vector<1x256xf32>
    %190 = vector.broadcast %77 : vector<3x1xf32> to vector<3x256xf32>
    %191 = vector.broadcast %189 : vector<1x256xf32> to vector<3x256xf32>
    %192 = arith.mulf %190, %191 : vector<3x256xf32>
    %193 = vector.broadcast %64 : vector<3x1xf32> to vector<3x256xf32>
    %194 = arith.addf %193, %192 : vector<3x256xf32>
    %195 = vector.extract_strided_slice %188 {offsets = [1, 0], sizes = [1, 256], strides = [1, 1]} : vector<8x256xf32> to vector<1x256xf32>
    %196 = vector.broadcast %90 : vector<3x1xf32> to vector<3x256xf32>
    %197 = vector.broadcast %195 : vector<1x256xf32> to vector<3x256xf32>
    %198 = arith.mulf %196, %197 : vector<3x256xf32>
    %199 = arith.addf %194, %198 : vector<3x256xf32>
    %200 = vector.extract_strided_slice %188 {offsets = [2, 0], sizes = [1, 256], strides = [1, 1]} : vector<8x256xf32> to vector<1x256xf32>
    %201 = vector.broadcast %103 : vector<3x1xf32> to vector<3x256xf32>
    %202 = vector.broadcast %200 : vector<1x256xf32> to vector<3x256xf32>
    %203 = arith.mulf %201, %202 : vector<3x256xf32>
    %204 = arith.addf %199, %203 : vector<3x256xf32>
    %205 = vector.extract_strided_slice %188 {offsets = [3, 0], sizes = [1, 256], strides = [1, 1]} : vector<8x256xf32> to vector<1x256xf32>
    %206 = vector.broadcast %116 : vector<3x1xf32> to vector<3x256xf32>
    %207 = vector.broadcast %205 : vector<1x256xf32> to vector<3x256xf32>
    %208 = arith.mulf %206, %207 : vector<3x256xf32>
    %209 = arith.addf %204, %208 : vector<3x256xf32>
    %210 = vector.extract_strided_slice %188 {offsets = [4, 0], sizes = [1, 256], strides = [1, 1]} : vector<8x256xf32> to vector<1x256xf32>
    %211 = vector.broadcast %129 : vector<3x1xf32> to vector<3x256xf32>
    %212 = vector.broadcast %210 : vector<1x256xf32> to vector<3x256xf32>
    %213 = arith.mulf %211, %212 : vector<3x256xf32>
    %214 = arith.addf %209, %213 : vector<3x256xf32>
    %215 = vector.extract_strided_slice %188 {offsets = [5, 0], sizes = [1, 256], strides = [1, 1]} : vector<8x256xf32> to vector<1x256xf32>
    %216 = vector.broadcast %142 : vector<3x1xf32> to vector<3x256xf32>
    %217 = vector.broadcast %215 : vector<1x256xf32> to vector<3x256xf32>
    %218 = arith.mulf %216, %217 : vector<3x256xf32>
    %219 = arith.addf %214, %218 : vector<3x256xf32>
    %220 = vector.extract_strided_slice %188 {offsets = [6, 0], sizes = [1, 256], strides = [1, 1]} : vector<8x256xf32> to vector<1x256xf32>
    %221 = vector.broadcast %155 : vector<3x1xf32> to vector<3x256xf32>
    %222 = vector.broadcast %220 : vector<1x256xf32> to vector<3x256xf32>
    %223 = arith.mulf %221, %222 : vector<3x256xf32>
    %224 = arith.addf %219, %223 : vector<3x256xf32>
    %225 = vector.extract_strided_slice %188 {offsets = [7, 0], sizes = [1, 256], strides = [1, 1]} : vector<8x256xf32> to vector<1x256xf32>
    %226 = vector.broadcast %168 : vector<3x1xf32> to vector<3x256xf32>
    %227 = vector.broadcast %225 : vector<1x256xf32> to vector<3x256xf32>
    %228 = arith.mulf %226, %227 : vector<3x256xf32>
    %229 = arith.addf %224, %228 : vector<3x256xf32>
    %cst_56 = arith.constant 1.000000e+00 : f32
    %230 = vector.broadcast %cst_56 : f32 to vector<3x256xf32>
    %231 = arith.mulf %230, %170 : vector<3x256xf32>
    %232 = arith.addf %229, %231 : vector<3x256xf32>
    %233 = math.tanh %232 : vector<3x256xf32>
    %c0_57 = arith.constant 0 : index
    %c0_58 = arith.constant 0 : index
    %c0_59 = arith.constant 0 : index
    %234 = vector.load %arg5[%c0_57, %c0_58, %c0_59] : memref<2x3x256xf32, #tpu.memory_space<vmem>>, vector<1x3x256xf32>
    %235 = vector.shape_cast %234 : vector<1x3x256xf32> to vector<3x256xf32>
    %236 = vector.shape_cast %233 : vector<3x256xf32> to vector<1x3x256xf32>
    tpu.vector_store %arg5[%c0_57, %c0_58, %c0_59], %236 {strides = array<i32>} : memref<2x3x256xf32, #tpu.memory_space<vmem>>, vector<1x3x256xf32>,
    %237 = vector.extract_strided_slice %8 {offsets = [1, 0], sizes = [1, 128], strides = [1, 1]} : vector<2x128xf32> to vector<1x128xf32>
    %c24_i32_60 = arith.constant 24 : i32
    %238 = vector.broadcast %c24_i32_60 : i32 to vector<8x128xi32>
    %239 = arith.addi %238, %10 : vector<8x128xi32>
    %240 = arith.cmpi eq, %9, %239 : vector<8x128xi32>
    %cst_61 = arith.constant 0.000000e+00 : f32
    %241 = vector.shape_cast %237 : vector<1x128xf32> to vector<1x128xf32>
    %242 = vector.broadcast %241 : vector<1x128xf32> to vector<8x128xf32>
    %243 = vector.broadcast %cst_61 : f32 to vector<8x128xf32>
    %244 = arith.select %240, %242, %243 : vector<8x128xi1>, vector<8x128xf32>
    %cst_62 = arith.constant dense<0.000000e+00> : vector<8xf32>
    %245 = vector.multi_reduction <add>, %244, %cst_62 [1] : vector<8x128xf32> to vector<8xf32>
    %246 = vector.shape_cast %245 : vector<8xf32> to vector<8x1xf32>
    %c3_i32_63 = arith.constant 3 : i32
    %247 = vector.broadcast %c3_i32_63 : i32 to vector<8x128xi32>
    %248 = arith.muli %247, %10 : vector<8x128xi32>
    %c0_i32_64 = arith.constant 0 : i32
    %249 = vector.broadcast %c0_i32_64 : i32 to vector<8x128xi32>
    %250 = arith.addi %248, %249 : vector<8x128xi32>
    %251 = arith.cmpi eq, %9, %250 : vector<8x128xi32>
    %cst_65 = arith.constant 0.000000e+00 : f32
    %252 = vector.shape_cast %237 : vector<1x128xf32> to vector<1x128xf32>
    %253 = vector.broadcast %252 : vector<1x128xf32> to vector<8x128xf32>
    %254 = vector.broadcast %cst_65 : f32 to vector<8x128xf32>
    %255 = arith.select %251, %253, %254 : vector<8x128xi1>, vector<8x128xf32>
    %cst_66 = arith.constant dense<0.000000e+00> : vector<8xf32>
    %256 = vector.multi_reduction <add>, %255, %cst_66 [1] : vector<8x128xf32> to vector<8xf32>
    %257 = vector.shape_cast %256 : vector<8xf32> to vector<8x1xf32>
    %c3_i32_67 = arith.constant 3 : i32
    %258 = vector.broadcast %c3_i32_67 : i32 to vector<8x128xi32>
    %259 = arith.muli %258, %10 : vector<8x128xi32>
    %c1_i32_68 = arith.constant 1 : i32
    %260 = vector.broadcast %c1_i32_68 : i32 to vector<8x128xi32>
    %261 = arith.addi %259, %260 : vector<8x128xi32>
    %262 = arith.cmpi eq, %9, %261 : vector<8x128xi32>
    %cst_69 = arith.constant 0.000000e+00 : f32
    %263 = vector.shape_cast %237 : vector<1x128xf32> to vector<1x128xf32>
    %264 = vector.broadcast %263 : vector<1x128xf32> to vector<8x128xf32>
    %265 = vector.broadcast %cst_69 : f32 to vector<8x128xf32>
    %266 = arith.select %262, %264, %265 : vector<8x128xi1>, vector<8x128xf32>
    %cst_70 = arith.constant dense<0.000000e+00> : vector<8xf32>
    %267 = vector.multi_reduction <add>, %266, %cst_70 [1] : vector<8x128xf32> to vector<8xf32>
    %268 = vector.shape_cast %267 : vector<8xf32> to vector<8x1xf32>
    %c3_i32_71 = arith.constant 3 : i32
    %269 = vector.broadcast %c3_i32_71 : i32 to vector<8x128xi32>
    %270 = arith.muli %269, %10 : vector<8x128xi32>
    %c2_i32_72 = arith.constant 2 : i32
    %271 = vector.broadcast %c2_i32_72 : i32 to vector<8x128xi32>
    %272 = arith.addi %270, %271 : vector<8x128xi32>
    %273 = arith.cmpi eq, %9, %272 : vector<8x128xi32>
    %cst_73 = arith.constant 0.000000e+00 : f32
    %274 = vector.shape_cast %237 : vector<1x128xf32> to vector<1x128xf32>
    %275 = vector.broadcast %274 : vector<1x128xf32> to vector<8x128xf32>
    %276 = vector.broadcast %cst_73 : f32 to vector<8x128xf32>
    %277 = arith.select %273, %275, %276 : vector<8x128xi1>, vector<8x128xf32>
    %cst_74 = arith.constant dense<0.000000e+00> : vector<8xf32>
    %278 = vector.multi_reduction <add>, %277, %cst_74 [1] : vector<8x128xf32> to vector<8xf32>
    %279 = vector.shape_cast %278 : vector<8xf32> to vector<8x1xf32>
    %c56_i32_75 = arith.constant 56 : i32
    %280 = vector.broadcast %c56_i32_75 : i32 to vector<3x128xi32>
    %281 = arith.addi %280, %12 : vector<3x128xi32>
    %282 = arith.cmpi eq, %11, %281 : vector<3x128xi32>
    %cst_76 = arith.constant 0.000000e+00 : f32
    %283 = vector.shape_cast %237 : vector<1x128xf32> to vector<1x128xf32>
    %284 = vector.broadcast %283 : vector<1x128xf32> to vector<3x128xf32>
    %285 = vector.broadcast %cst_76 : f32 to vector<3x128xf32>
    %286 = arith.select %282, %284, %285 : vector<3x128xi1>, vector<3x128xf32>
    %cst_77 = arith.constant dense<0.000000e+00> : vector<3xf32>
    %287 = vector.multi_reduction <add>, %286, %cst_77 [1] : vector<3x128xf32> to vector<3xf32>
    %288 = vector.shape_cast %287 : vector<3xf32> to vector<3x1xf32>
    %c8_i32_78 = arith.constant 8 : i32
    %289 = vector.broadcast %c8_i32_78 : i32 to vector<3x128xi32>
    %290 = arith.muli %289, %12 : vector<3x128xi32>
    %c32_i32_79 = arith.constant 32 : i32
    %291 = vector.broadcast %c32_i32_79 : i32 to vector<3x128xi32>
    %292 = arith.addi %291, %290 : vector<3x128xi32>
    %c0_i32_80 = arith.constant 0 : i32
    %293 = vector.broadcast %c0_i32_80 : i32 to vector<3x128xi32>
    %294 = arith.addi %292, %293 : vector<3x128xi32>
    %295 = arith.cmpi eq, %11, %294 : vector<3x128xi32>
    %cst_81 = arith.constant 0.000000e+00 : f32
    %296 = vector.shape_cast %237 : vector<1x128xf32> to vector<1x128xf32>
    %297 = vector.broadcast %296 : vector<1x128xf32> to vector<3x128xf32>
    %298 = vector.broadcast %cst_81 : f32 to vector<3x128xf32>
    %299 = arith.select %295, %297, %298 : vector<3x128xi1>, vector<3x128xf32>
    %cst_82 = arith.constant dense<0.000000e+00> : vector<3xf32>
    %300 = vector.multi_reduction <add>, %299, %cst_82 [1] : vector<3x128xf32> to vector<3xf32>
    %301 = vector.shape_cast %300 : vector<3xf32> to vector<3x1xf32>
    %c8_i32_83 = arith.constant 8 : i32
    %302 = vector.broadcast %c8_i32_83 : i32 to vector<3x128xi32>
    %303 = arith.muli %302, %12 : vector<3x128xi32>
    %c32_i32_84 = arith.constant 32 : i32
    %304 = vector.broadcast %c32_i32_84 : i32 to vector<3x128xi32>
    %305 = arith.addi %304, %303 : vector<3x128xi32>
    %c1_i32_85 = arith.constant 1 : i32
    %306 = vector.broadcast %c1_i32_85 : i32 to vector<3x128xi32>
    %307 = arith.addi %305, %306 : vector<3x128xi32>
    %308 = arith.cmpi eq, %11, %307 : vector<3x128xi32>
    %cst_86 = arith.constant 0.000000e+00 : f32
    %309 = vector.shape_cast %237 : vector<1x128xf32> to vector<1x128xf32>
    %310 = vector.broadcast %309 : vector<1x128xf32> to vector<3x128xf32>
    %311 = vector.broadcast %cst_86 : f32 to vector<3x128xf32>
    %312 = arith.select %308, %310, %311 : vector<3x128xi1>, vector<3x128xf32>
    %cst_87 = arith.constant dense<0.000000e+00> : vector<3xf32>
    %313 = vector.multi_reduction <add>, %312, %cst_87 [1] : vector<3x128xf32> to vector<3xf32>
    %314 = vector.shape_cast %313 : vector<3xf32> to vector<3x1xf32>
    %c8_i32_88 = arith.constant 8 : i32
    %315 = vector.broadcast %c8_i32_88 : i32 to vector<3x128xi32>
    %316 = arith.muli %315, %12 : vector<3x128xi32>
    %c32_i32_89 = arith.constant 32 : i32
    %317 = vector.broadcast %c32_i32_89 : i32 to vector<3x128xi32>
    %318 = arith.addi %317, %316 : vector<3x128xi32>
    %c2_i32_90 = arith.constant 2 : i32
    %319 = vector.broadcast %c2_i32_90 : i32 to vector<3x128xi32>
    %320 = arith.addi %318, %319 : vector<3x128xi32>
    %321 = arith.cmpi eq, %11, %320 : vector<3x128xi32>
    %cst_91 = arith.constant 0.000000e+00 : f32
    %322 = vector.shape_cast %237 : vector<1x128xf32> to vector<1x128xf32>
    %323 = vector.broadcast %322 : vector<1x128xf32> to vector<3x128xf32>
    %324 = vector.broadcast %cst_91 : f32 to vector<3x128xf32>
    %325 = arith.select %321, %323, %324 : vector<3x128xi1>, vector<3x128xf32>
    %cst_92 = arith.constant dense<0.000000e+00> : vector<3xf32>
    %326 = vector.multi_reduction <add>, %325, %cst_92 [1] : vector<3x128xf32> to vector<3xf32>
    %327 = vector.shape_cast %326 : vector<3xf32> to vector<3x1xf32>
    %c8_i32_93 = arith.constant 8 : i32
    %328 = vector.broadcast %c8_i32_93 : i32 to vector<3x128xi32>
    %329 = arith.muli %328, %12 : vector<3x128xi32>
    %c32_i32_94 = arith.constant 32 : i32
    %330 = vector.broadcast %c32_i32_94 : i32 to vector<3x128xi32>
    %331 = arith.addi %330, %329 : vector<3x128xi32>
    %c3_i32_95 = arith.constant 3 : i32
    %332 = vector.broadcast %c3_i32_95 : i32 to vector<3x128xi32>
    %333 = arith.addi %331, %332 : vector<3x128xi32>
    %334 = arith.cmpi eq, %11, %333 : vector<3x128xi32>
    %cst_96 = arith.constant 0.000000e+00 : f32
    %335 = vector.shape_cast %237 : vector<1x128xf32> to vector<1x128xf32>
    %336 = vector.broadcast %335 : vector<1x128xf32> to vector<3x128xf32>
    %337 = vector.broadcast %cst_96 : f32 to vector<3x128xf32>
    %338 = arith.select %334, %336, %337 : vector<3x128xi1>, vector<3x128xf32>
    %cst_97 = arith.constant dense<0.000000e+00> : vector<3xf32>
    %339 = vector.multi_reduction <add>, %338, %cst_97 [1] : vector<3x128xf32> to vector<3xf32>
    %340 = vector.shape_cast %339 : vector<3xf32> to vector<3x1xf32>
    %c8_i32_98 = arith.constant 8 : i32
    %341 = vector.broadcast %c8_i32_98 : i32 to vector<3x128xi32>
    %342 = arith.muli %341, %12 : vector<3x128xi32>
    %c32_i32_99 = arith.constant 32 : i32
    %343 = vector.broadcast %c32_i32_99 : i32 to vector<3x128xi32>
    %344 = arith.addi %343, %342 : vector<3x128xi32>
    %c4_i32_100 = arith.constant 4 : i32
    %345 = vector.broadcast %c4_i32_100 : i32 to vector<3x128xi32>
    %346 = arith.addi %344, %345 : vector<3x128xi32>
    %347 = arith.cmpi eq, %11, %346 : vector<3x128xi32>
    %cst_101 = arith.constant 0.000000e+00 : f32
    %348 = vector.shape_cast %237 : vector<1x128xf32> to vector<1x128xf32>
    %349 = vector.broadcast %348 : vector<1x128xf32> to vector<3x128xf32>
    %350 = vector.broadcast %cst_101 : f32 to vector<3x128xf32>
    %351 = arith.select %347, %349, %350 : vector<3x128xi1>, vector<3x128xf32>
    %cst_102 = arith.constant dense<0.000000e+00> : vector<3xf32>
    %352 = vector.multi_reduction <add>, %351, %cst_102 [1] : vector<3x128xf32> to vector<3xf32>
    %353 = vector.shape_cast %352 : vector<3xf32> to vector<3x1xf32>
    %c8_i32_103 = arith.constant 8 : i32
    %354 = vector.broadcast %c8_i32_103 : i32 to vector<3x128xi32>
    %355 = arith.muli %354, %12 : vector<3x128xi32>
    %c32_i32_104 = arith.constant 32 : i32
    %356 = vector.broadcast %c32_i32_104 : i32 to vector<3x128xi32>
    %357 = arith.addi %356, %355 : vector<3x128xi32>
    %c5_i32_105 = arith.constant 5 : i32
    %358 = vector.broadcast %c5_i32_105 : i32 to vector<3x128xi32>
    %359 = arith.addi %357, %358 : vector<3x128xi32>
    %360 = arith.cmpi eq, %11, %359 : vector<3x128xi32>
    %cst_106 = arith.constant 0.000000e+00 : f32
    %361 = vector.shape_cast %237 : vector<1x128xf32> to vector<1x128xf32>
    %362 = vector.broadcast %361 : vector<1x128xf32> to vector<3x128xf32>
    %363 = vector.broadcast %cst_106 : f32 to vector<3x128xf32>
    %364 = arith.select %360, %362, %363 : vector<3x128xi1>, vector<3x128xf32>
    %cst_107 = arith.constant dense<0.000000e+00> : vector<3xf32>
    %365 = vector.multi_reduction <add>, %364, %cst_107 [1] : vector<3x128xf32> to vector<3xf32>
    %366 = vector.shape_cast %365 : vector<3xf32> to vector<3x1xf32>
    %c8_i32_108 = arith.constant 8 : i32
    %367 = vector.broadcast %c8_i32_108 : i32 to vector<3x128xi32>
    %368 = arith.muli %367, %12 : vector<3x128xi32>
    %c32_i32_109 = arith.constant 32 : i32
    %369 = vector.broadcast %c32_i32_109 : i32 to vector<3x128xi32>
    %370 = arith.addi %369, %368 : vector<3x128xi32>
    %c6_i32_110 = arith.constant 6 : i32
    %371 = vector.broadcast %c6_i32_110 : i32 to vector<3x128xi32>
    %372 = arith.addi %370, %371 : vector<3x128xi32>
    %373 = arith.cmpi eq, %11, %372 : vector<3x128xi32>
    %cst_111 = arith.constant 0.000000e+00 : f32
    %374 = vector.shape_cast %237 : vector<1x128xf32> to vector<1x128xf32>
    %375 = vector.broadcast %374 : vector<1x128xf32> to vector<3x128xf32>
    %376 = vector.broadcast %cst_111 : f32 to vector<3x128xf32>
    %377 = arith.select %373, %375, %376 : vector<3x128xi1>, vector<3x128xf32>
    %cst_112 = arith.constant dense<0.000000e+00> : vector<3xf32>
    %378 = vector.multi_reduction <add>, %377, %cst_112 [1] : vector<3x128xf32> to vector<3xf32>
    %379 = vector.shape_cast %378 : vector<3xf32> to vector<3x1xf32>
    %c8_i32_113 = arith.constant 8 : i32
    %380 = vector.broadcast %c8_i32_113 : i32 to vector<3x128xi32>
    %381 = arith.muli %380, %12 : vector<3x128xi32>
    %c32_i32_114 = arith.constant 32 : i32
    %382 = vector.broadcast %c32_i32_114 : i32 to vector<3x128xi32>
    %383 = arith.addi %382, %381 : vector<3x128xi32>
    %c7_i32_115 = arith.constant 7 : i32
    %384 = vector.broadcast %c7_i32_115 : i32 to vector<3x128xi32>
    %385 = arith.addi %383, %384 : vector<3x128xi32>
    %386 = arith.cmpi eq, %11, %385 : vector<3x128xi32>
    %cst_116 = arith.constant 0.000000e+00 : f32
    %387 = vector.shape_cast %237 : vector<1x128xf32> to vector<1x128xf32>
    %388 = vector.broadcast %387 : vector<1x128xf32> to vector<3x128xf32>
    %389 = vector.broadcast %cst_116 : f32 to vector<3x128xf32>
    %390 = arith.select %386, %388, %389 : vector<3x128xi1>, vector<3x128xf32>
    %cst_117 = arith.constant dense<0.000000e+00> : vector<3xf32>
    %391 = vector.multi_reduction <add>, %390, %cst_117 [1] : vector<3x128xf32> to vector<3xf32>
    %392 = vector.shape_cast %391 : vector<3xf32> to vector<3x1xf32>
    %c1 = arith.constant 1 : index
    %c0_118 = arith.constant 0 : index
    %c0_119 = arith.constant 0 : index
    %393 = vector.load %arg2[%c1, %c0_118, %c0_119] : memref<2x3x256xf32, #tpu.memory_space<vmem>>, vector<1x3x256xf32>
    %394 = vector.shape_cast %393 : vector<1x3x256xf32> to vector<3x256xf32>
    %395 = vector.extract_strided_slice %394 {offsets = [0, 0], sizes = [1, 256], strides = [1, 1]} : vector<3x256xf32> to vector<1x256xf32>
    %396 = vector.broadcast %257 : vector<8x1xf32> to vector<8x256xf32>
    %397 = vector.broadcast %395 : vector<1x256xf32> to vector<8x256xf32>
    %398 = arith.mulf %396, %397 : vector<8x256xf32>
    %399 = vector.broadcast %246 : vector<8x1xf32> to vector<8x256xf32>
    %400 = arith.addf %399, %398 : vector<8x256xf32>
    %401 = vector.extract_strided_slice %394 {offsets = [1, 0], sizes = [1, 256], strides = [1, 1]} : vector<3x256xf32> to vector<1x256xf32>
    %402 = vector.broadcast %268 : vector<8x1xf32> to vector<8x256xf32>
    %403 = vector.broadcast %401 : vector<1x256xf32> to vector<8x256xf32>
    %404 = arith.mulf %402, %403 : vector<8x256xf32>
    %405 = arith.addf %400, %404 : vector<8x256xf32>
    %406 = vector.extract_strided_slice %394 {offsets = [2, 0], sizes = [1, 256], strides = [1, 1]} : vector<3x256xf32> to vector<1x256xf32>
    %407 = vector.broadcast %279 : vector<8x1xf32> to vector<8x256xf32>
    %408 = vector.broadcast %406 : vector<1x256xf32> to vector<8x256xf32>
    %409 = arith.mulf %407, %408 : vector<8x256xf32>
    %410 = arith.addf %405, %409 : vector<8x256xf32>
    %cst_120 = arith.constant 0.000000e+00 : f32
    %411 = vector.broadcast %cst_120 : f32 to vector<8x256xf32>
    %412 = arith.maximumf %410, %411 : vector<8x256xf32>
    %413 = vector.extract_strided_slice %412 {offsets = [0, 0], sizes = [1, 256], strides = [1, 1]} : vector<8x256xf32> to vector<1x256xf32>
    %414 = vector.broadcast %301 : vector<3x1xf32> to vector<3x256xf32>
    %415 = vector.broadcast %413 : vector<1x256xf32> to vector<3x256xf32>
    %416 = arith.mulf %414, %415 : vector<3x256xf32>
    %417 = vector.broadcast %288 : vector<3x1xf32> to vector<3x256xf32>
    %418 = arith.addf %417, %416 : vector<3x256xf32>
    %419 = vector.extract_strided_slice %412 {offsets = [1, 0], sizes = [1, 256], strides = [1, 1]} : vector<8x256xf32> to vector<1x256xf32>
    %420 = vector.broadcast %314 : vector<3x1xf32> to vector<3x256xf32>
    %421 = vector.broadcast %419 : vector<1x256xf32> to vector<3x256xf32>
    %422 = arith.mulf %420, %421 : vector<3x256xf32>
    %423 = arith.addf %418, %422 : vector<3x256xf32>
    %424 = vector.extract_strided_slice %412 {offsets = [2, 0], sizes = [1, 256], strides = [1, 1]} : vector<8x256xf32> to vector<1x256xf32>
    %425 = vector.broadcast %327 : vector<3x1xf32> to vector<3x256xf32>
    %426 = vector.broadcast %424 : vector<1x256xf32> to vector<3x256xf32>
    %427 = arith.mulf %425, %426 : vector<3x256xf32>
    %428 = arith.addf %423, %427 : vector<3x256xf32>
    %429 = vector.extract_strided_slice %412 {offsets = [3, 0], sizes = [1, 256], strides = [1, 1]} : vector<8x256xf32> to vector<1x256xf32>
    %430 = vector.broadcast %340 : vector<3x1xf32> to vector<3x256xf32>
    %431 = vector.broadcast %429 : vector<1x256xf32> to vector<3x256xf32>
    %432 = arith.mulf %430, %431 : vector<3x256xf32>
    %433 = arith.addf %428, %432 : vector<3x256xf32>
    %434 = vector.extract_strided_slice %412 {offsets = [4, 0], sizes = [1, 256], strides = [1, 1]} : vector<8x256xf32> to vector<1x256xf32>
    %435 = vector.broadcast %353 : vector<3x1xf32> to vector<3x256xf32>
    %436 = vector.broadcast %434 : vector<1x256xf32> to vector<3x256xf32>
    %437 = arith.mulf %435, %436 : vector<3x256xf32>
    %438 = arith.addf %433, %437 : vector<3x256xf32>
    %439 = vector.extract_strided_slice %412 {offsets = [5, 0], sizes = [1, 256], strides = [1, 1]} : vector<8x256xf32> to vector<1x256xf32>
    %440 = vector.broadcast %366 : vector<3x1xf32> to vector<3x256xf32>
    %441 = vector.broadcast %439 : vector<1x256xf32> to vector<3x256xf32>
    %442 = arith.mulf %440, %441 : vector<3x256xf32>
    %443 = arith.addf %438, %442 : vector<3x256xf32>
    %444 = vector.extract_strided_slice %412 {offsets = [6, 0], sizes = [1, 256], strides = [1, 1]} : vector<8x256xf32> to vector<1x256xf32>
    %445 = vector.broadcast %379 : vector<3x1xf32> to vector<3x256xf32>
    %446 = vector.broadcast %444 : vector<1x256xf32> to vector<3x256xf32>
    %447 = arith.mulf %445, %446 : vector<3x256xf32>
    %448 = arith.addf %443, %447 : vector<3x256xf32>
    %449 = vector.extract_strided_slice %412 {offsets = [7, 0], sizes = [1, 256], strides = [1, 1]} : vector<8x256xf32> to vector<1x256xf32>
    %450 = vector.broadcast %392 : vector<3x1xf32> to vector<3x256xf32>
    %451 = vector.broadcast %449 : vector<1x256xf32> to vector<3x256xf32>
    %452 = arith.mulf %450, %451 : vector<3x256xf32>
    %453 = arith.addf %448, %452 : vector<3x256xf32>
    %cst_121 = arith.constant 1.000000e+00 : f32
    %454 = vector.broadcast %cst_121 : f32 to vector<3x256xf32>
    %455 = arith.mulf %454, %394 : vector<3x256xf32>
    %456 = arith.addf %453, %455 : vector<3x256xf32>
    %457 = math.tanh %456 : vector<3x256xf32>
    %c1_122 = arith.constant 1 : index
    %c0_123 = arith.constant 0 : index
    %c0_124 = arith.constant 0 : index
    %458 = vector.load %arg5[%c1_122, %c0_123, %c0_124] : memref<2x3x256xf32, #tpu.memory_space<vmem>>, vector<1x3x256xf32>
    %459 = vector.shape_cast %458 : vector<1x3x256xf32> to vector<3x256xf32>
    %460 = vector.shape_cast %457 : vector<3x256xf32> to vector<1x3x256xf32>
    tpu.vector_store %arg5[%c1_122, %c0_123, %c0_124], %460 {strides = array<i32>} : memref<2x3x256xf32, #tpu.memory_space<vmem>>, vector<1x3x256xf32>,
    return
  }
  func.func @transform_0(%arg0: i32) -> (i32, i32) {
    %c0_i32 = arith.constant 0 : i32
    %c0_i32_0 = arith.constant 0 : i32
    return %arg0, %c0_i32 : i32, i32
  }
  func.func @transform_1(%arg0: i32) -> (i32, i32, i32) {
    %c0_i32 = arith.constant 0 : i32
    %c0_i32_0 = arith.constant 0 : i32
    %c0_i32_1 = arith.constant 0 : i32
    return %arg0, %c0_i32, %c0_i32_0 : i32, i32, i32
  }
  func.func @transform_2(%arg0: i32) -> (i32, i32) {
    %c0_i32 = arith.constant 0 : i32
    %c0_i32_0 = arith.constant 0 : i32
    %c0_i32_1 = arith.constant 0 : i32
    return %c0_i32, %c0_i32_0 : i32, i32
  }
  func.func @transform_3(%arg0: i32) -> (i32, i32) {
    %c0_i32 = arith.constant 0 : i32
    %c0_i32_0 = arith.constant 0 : i32
    %c0_i32_1 = arith.constant 0 : i32
    return %c0_i32, %c0_i32_0 : i32, i32
  }
  func.func @transform_4(%arg0: i32) -> (i32, i32, i32) {
    %c0_i32 = arith.constant 0 : i32
    %c0_i32_0 = arith.constant 0 : i32
    %c0_i32_1 = arith.constant 0 : i32
    return %arg0, %c0_i32, %c0_i32_0 : i32, i32, i32
  }
}

</mosaic_0001>

<bundles_post_ra>
// kernel: tpu_custom_call.1
= control target key start
LH: loop header
LB: loop body
LE: loop exit
PB: predicated region body
PF: predicated region fallthrough
CT: control target
= control target key end

     0   :  { %9 = vsyncpa [#allocation3], 0  ;;  %s1027_s15 = smov [#allocation2]   ;;  %s1312_s0 = inlined_call_operand.vmem [shape: f32[2,768], index: 0, kind: input, shape index: {}]   ;;  %s1313_s1 = inlined_call_operand.vmem [shape: f32[2,3,256], index: 1, kind: input, shape index: {}]   ;;  %s1314_s2 = inlined_call_operand.hbm [shape: f32[768,128], index: 2, kind: input, shape index: {}]   ;;  %s1315_s3 = inlined_call_operand.vmem [shape: f32[1,128], index: 3, kind: input, shape index: {}]   ;;  %s1316_s4 = inlined_call_operand.vmem [shape: f32[2,3,256], index: 4, kind: output, shape index: {}]  }
   0x1   :  { %s19_s16 = sshll.u32 %s1027_s15, 4  ;;  %s20_s16 = int_to_ptr.vmem [resolvable:$true] %s19_s16 }
   0x2   :  { %s1013_s17 = scalar_lea.vmem %s20_s16, 12288  ;;  %p1018_p1 = scmp.lt.s32.totalorder %s20_s16, %s20_s16 }
   0x3   :  { %p1014_p0 = scmp.ne.s32.totalorder %s20_s16, %s1013_s17  ;;  %p1019_p2 = scmp.lt.s32.totalorder %s1013_s17, %s1013_s17 }
   0x5   :  { %p1020_p3 = por %p1019_p2, %p1018_p1 }
   0x7   :  { %p1021_p4 = pnand %p1020_p3, %p1014_p0 }
   0x9   :  { %1024 = shalt.err (!%p1021_p4)
}
   0xa   :  { %s1028_s18 = smov 128   ;;  %s1029_s19 = smov 8  }
   0xb   :  { %25 = dma.hbm_to_vmem [thread:$0]  %s1314_s2, 12288, %s20_s16, [#allocation3], %s1028_s18, %s1028_s18, %s1029_s19  }
   0xc   :  { %1025 = dma.done.wait [#allocation3], 12288  }
   0xd   :  { %1026 = vsyncadd [#allocation3], 4294955008  ;;  %v65_v0 = vld [vmem:[#allocation2 + $0xf8] sm:$0xff]  ;;  %v64_v4 = vld [vmem:[#allocation2 + $0xf0] sm:$0xff]  ;;  %v1030_v30 = vmov 1983009808   ;;  %v136_v32 = vlaneseq }
   0xe   :  { %v97_v1 = vld [vmem:[#allocation2 + $0x1f8] sm:$0xff]  ;;  %883 = vmatprep.subr.mxu0 %v65_v0  ;;  %v96_v5 = vld [vmem:[#allocation2 + $0x1f0] sm:$0xff]  ;;  %v63_v8 = vld [vmem:[#allocation2 + $0xe8] sm:$0xff]  ;;  %v134_v31 = vunpack.c.l.s4 %v1030_v30  ;;  %vm413_vm5 = vcmask 1042432  }
   0xf   :  { %v49_v2 = vld [vmem:[#allocation2 + $0x78] sm:$0xff]  ;;  %918 = vmatprep.subr.mxu1 %v97_v1  ;;  %v48_v6 = vld [vmem:[#allocation2 + $0x70] sm:$0xff]  ;;  %v95_v9 = vld [vmem:[#allocation2 + $0x1e8] sm:$0xff]  ;;  %v1060_v42 = vshrl.u32 %v136_v32, 7 }
  0x10   :  { %v81_v3 = vld [vmem:[#allocation2 + $0x178] sm:$0xff]  ;;  %884 = vmatpush3.msra.mxu0 %v49_v2  ;;  %v80_v7 = vld [vmem:[#allocation2 + $0x170] sm:$0xff]  ;;  %v47_v10 = vld [vmem:[#allocation2 + $0x68] sm:$0xff]  ;;  %v135_v41 = vunpack.c.0.s8 %v134_v31 }
  0x11   :  { %919 = vmatpush3.msra.mxu1 %v81_v3  ;;  %885 = vmatprep.subr.mxu0 %v64_v4  ;;  %v79_v11 = vld [vmem:[#allocation2 + $0x168] sm:$0xff]  ;;  %v62_v12 = vld [vmem:[#allocation2 + $0xe0] sm:$0xff]  ;;  %v61_v16 = vld [vmem:[#allocation2 + $0xd8] sm:$0xff] }
  0x12   :  { %920 = vmatprep.subr.mxu1 %v96_v5  ;;  %886 = vmatpush3.msra.mxu0 %v48_v6  ;;  %v94_v13 = vld [vmem:[#allocation2 + $0x1e0] sm:$0xff]  ;;  %v93_v17 = vld [vmem:[#allocation2 + $0x1d8] sm:$0xff]  ;;  %v60_v20 = vld [vmem:[#allocation2 + $0xd0] sm:$0xff]  ;;  %v138_v51 = vsub.s32 %v135_v41, %v1060_v42 }
  0x13   :  { %921 = vmatpush3.msra.mxu1 %v80_v7  ;;  %887 = vmatprep.subr.mxu0 %v63_v8  ;;  %v46_v14 = vld [vmem:[#allocation2 + $0x60] sm:$0xff]  ;;  %v45_v18 = vld [vmem:[#allocation2 + $0x58] sm:$0xff]  ;;  %v92_v21 = vld [vmem:[#allocation2 + $0x1d0] sm:$0xff] }
  0x14   :  { %922 = vmatprep.subr.mxu1 %v95_v9  ;;  %v78_v15 = vld [vmem:[#allocation2 + $0x160] sm:$0xff]  ;;  %888 = vmatpush3.msra.mxu0 %v47_v10  ;;  %v77_v19 = vld [vmem:[#allocation2 + $0x158] sm:$0xff]  ;;  %v44_v22 = vld [vmem:[#allocation2 + $0x50] sm:$0xff] }
  0x15   :  { %923 = vmatpush3.msra.mxu1 %v79_v11  ;;  %889 = vmatprep.subr.mxu0 %v62_v12  ;;  %v76_v23 = vld [vmem:[#allocation2 + $0x150] sm:$0xff]  ;;  %v59_v24 = vld [vmem:[#allocation2 + $0xc8] sm:$0xff]  ;;  %v58_v28 = vld [vmem:[#allocation2 + $0xc0] sm:$0xff] }
  0x16   :  { %924 = vmatprep.subr.mxu1 %v94_v13  ;;  %890 = vmatpush3.msra.mxu0 %v46_v14  ;;  %v91_v25 = vld [vmem:[#allocation2 + $0x1c8] sm:$0xff]  ;;  %v90_v29 = vld [vmem:[#allocation2 + $0x1c0] sm:$0xff]  ;;  %v57_v35 = vld [vmem:[#allocation2 + $0xb8] sm:$0xff] }
  0x17   :  { %925 = vmatpush3.msra.mxu1 %v78_v15  ;;  %891 = vmatprep.subr.mxu0 %v61_v16  ;;  %v43_v26 = vld [vmem:[#allocation2 + $0x48] sm:$0xff]  ;;  %v42_v33 = vld [vmem:[#allocation2 + $0x40] sm:$0xff]  ;;  %v89_v36 = vld [vmem:[#allocation2 + $0x1b8] sm:$0xff] }
  0x18   :  { %926 = vmatprep.subr.mxu1 %v93_v17  ;;  %892 = vmatpush3.msra.mxu0 %v45_v18  ;;  %v75_v27 = vld [vmem:[#allocation2 + $0x148] sm:$0xff]  ;;  %v74_v34 = vld [vmem:[#allocation2 + $0x140] sm:$0xff]  ;;  %v41_v37 = vld [vmem:[#allocation2 + $0x38] sm:$0xff] }
  0x19   :  { %927 = vmatpush3.msra.mxu1 %v77_v19  ;;  %893 = vmatprep.subr.mxu0 %v60_v20  ;;  %v73_v38 = vld [vmem:[#allocation2 + $0x138] sm:$0xff]  ;;  %v56_v39 = vld [vmem:[#allocation2 + $0xb0] sm:$0xff]  ;;  %v55_v45 = vld [vmem:[#allocation2 + $0xa8] sm:$0xff] }
  0x1a   :  { %928 = vmatprep.subr.mxu1 %v92_v21  ;;  %894 = vmatpush3.msra.mxu0 %v44_v22  ;;  %v88_v40 = vld [vmem:[#allocation2 + $0x1b0] sm:$0xff]  ;;  %v87_v46 = vld [vmem:[#allocation2 + $0x1a8] sm:$0xff]  ;;  %v54_v49 = vld [vmem:[#allocation2 + $0xa0] sm:$0xff] }
  0x1b   :  { %929 = vmatpush3.msra.mxu1 %v76_v23  ;;  %895 = vmatprep.subr.mxu0 %v59_v24  ;;  %v40_v43 = vld [vmem:[#allocation2 + $0x30] sm:$0xff]  ;;  %v39_v47 = vld [vmem:[#allocation2 + $0x28] sm:$0xff]  ;;  %v86_v50 = vld [vmem:[#allocation2 + $0x1a0] sm:$0xff] }
  0x1c   :  { %930 = vmatprep.subr.mxu1 %v91_v25  ;;  %896 = vmatpush3.msra.mxu0 %v43_v26  ;;  %v72_v44 = vld [vmem:[#allocation2 + $0x130] sm:$0xff]  ;;  %v71_v48 = vld [vmem:[#allocation2 + $0x128] sm:$0xff]  ;;  %v38_v52 = vld [vmem:[#allocation2 + $0x20] sm:$0xff] }
  0x1d   :  { %931 = vmatpush3.msra.mxu1 %v75_v27  ;;  %897 = vmatprep.subr.mxu0 %v58_v28  ;;  %v70_v53 = vld [vmem:[#allocation2 + $0x120] sm:$0xff]  ;;  %v53_v55 = vld [vmem:[#allocation2 + $0x98] sm:$0xff]  ;;  %v52_v60 = vld [vmem:[#allocation2 + $0x90] sm:$0xff] }
  0x1e   :  { %932 = vmatprep.subr.mxu1 %v90_v29  ;;  %898 = vmatpush3.msra.mxu0 %v42_v33  ;;  %v32_v54 = vld [vmem:[%s1312_s0] sm:$0xff]  ;;  %v85_v56 = vld [vmem:[#allocation2 + $0x198] sm:$0xff]  ;;  %v84_v61 = vld [vmem:[#allocation2 + $0x190] sm:$0xff] }
  0x1f   :  { %933 = vmatpush3.msra.mxu1 %v74_v34  ;;  %899 = vmatprep.subr.mxu0 %v57_v35  ;;  %v132_v57 = vcombine.high %v32_v54, %v32_v54  ;;  %v37_v58 = vld [vmem:[#allocation2 + $0x18] sm:$0xff]  ;;  %v139_v62 = vrot.slane %v32_v54, %v138_v51  ;;  %v36_v63 = vld [vmem:[#allocation2 + $0x10] sm:$0xff]  ;;  %v51_v2 = vld [vmem:[#allocation2 + $0x88] sm:$0xff] }
  0x20   :  { %934 = vmatprep.subr.mxu1 %v89_v36  ;;  %900 = vmatpush3.msra.mxu0 %v41_v37  ;;  %v69_v59 = vld [vmem:[#allocation2 + $0x118] sm:$0xff]  ;;  %v68_v0 = vld [vmem:[#allocation2 + $0x110] sm:$0xff]  ;;  %v83_v3 = vld [vmem:[#allocation2 + $0x188] sm:$0xff] }
  0x21   :  { %935 = vmatpush3.msra.mxu1 %v73_v38  ;;  %901 = vmatprep.subr.mxu0 %v56_v39  ;;  %v146_v1 = vrot.slane %v132_v57, %v138_v51  ;;  %v35_v4 = vld [vmem:[#allocation2 + $0x8] sm:$0xff]  ;;  %v50_v6 = vld [vmem:[#allocation2 + $0x80] sm:$0xff]  ;;  %v147_v8 = vcombine.high %v139_v62, %v139_v62  ;;  %v129_v12 = vld [vmem:[#allocation2 + $0x2f8] sm:$0xff] }
  0x22   :  { %936 = vmatprep.subr.mxu1 %v88_v40  ;;  %902 = vmatpush3.msra.mxu0 %v40_v43  ;;  %v67_v5 = vld [vmem:[#allocation2 + $0x108] sm:$0xff]  ;;  %v82_v7 = vld [vmem:[#allocation2 + $0x180] sm:$0xff]  ;;  %v113_v14 = vld [vmem:[#allocation2 + $0x278] sm:$0xff] }
  0x23   :  { %937 = vmatpush3.msra.mxu1 %v72_v44  ;;  %903 = vmatprep.subr.mxu0 %v55_v45  ;;  %v34_v9 = vld [vmem:[#allocation2] sm:$0xff]  ;;  %v148_v10 = vcombine.high %v146_v1, %v146_v1  ;;  %v1069_v13 = vld.sshfl [vmem:[%s1312_s0 + $0x8] sm:$0x33 pattern:$0x76325410]  ;;  %v128_v16 = vld [vmem:[#allocation2 + $0x2f0] sm:$0xff] }
  0x24   :  { %938 = vmatprep.subr.mxu1 %v87_v46  ;;  %904 = vmatpush3.msra.mxu0 %v39_v47  ;;  %v66_v11 = vld [vmem:[#allocation2 + $0x100] sm:$0xff]  ;;  %v156_v15 = vcombine.high %v1069_v13, %v1069_v13  ;;  %v112_v17 = vld [vmem:[#allocation2 + $0x270] sm:$0xff]  ;;  %v127_v18 = vld [vmem:[#allocation2 + $0x2e8] sm:$0xff] }
  0x25   :  { %939 = vmatpush3.msra.mxu1 %v71_v48  ;;  %905 = vmatprep.subr.mxu0 %v54_v49  ;;  %v111_v19 = vld [vmem:[#allocation2 + $0x268] sm:$0xff]  ;;  %v126_v20 = vld [vmem:[#allocation2 + $0x2e0] sm:$0xff]  ;;  %v125_v22 = vld [vmem:[#allocation2 + $0x2d8] sm:$0xff] }
  0x26   :  { %940 = vmatprep.subr.mxu1 %v86_v50  ;;  %906 = vmatpush3.msra.mxu0 %v38_v52  ;;  %v110_v21 = vld [vmem:[#allocation2 + $0x260] sm:$0xff]  ;;  %v109_v23 = vld [vmem:[#allocation2 + $0x258] sm:$0xff]  ;;  %v124_v24 = vld [vmem:[#allocation2 + $0x2d0] sm:$0xff] }
  0x27   :  { %941 = vmatpush3.msra.mxu1 %v70_v53  ;;  %907 = vmatprep.subr.mxu0 %v53_v55  ;;  %v108_v25 = vld [vmem:[#allocation2 + $0x250] sm:$0xff]  ;;  %v123_v26 = vld [vmem:[#allocation2 + $0x2c8] sm:$0xff]  ;;  %v122_v28 = vld [vmem:[#allocation2 + $0x2c0] sm:$0xff] }
  0x28   :  { %942 = vmatprep.subr.mxu1 %v85_v56  ;;  %908 = vmatpush3.msra.mxu0 %v37_v58  ;;  %v107_v27 = vld [vmem:[#allocation2 + $0x248] sm:$0xff]  ;;  %v106_v29 = vld [vmem:[#allocation2 + $0x240] sm:$0xff]  ;;  %v121_v30 = vld [vmem:[#allocation2 + $0x2b8] sm:$0xff] }
  0x29   :  { %943 = vmatpush3.msra.mxu1 %v69_v59  ;;  %909 = vmatprep.subr.mxu0 %v52_v60  ;;  %v105_v31 = vld [vmem:[#allocation2 + $0x238] sm:$0xff]  ;;  %v120_v33 = vld [vmem:[#allocation2 + $0x2b0] sm:$0xff]  ;;  %v119_v35 = vld [vmem:[#allocation2 + $0x2a8] sm:$0xff] }
  0x2a   :  { %944 = vmatprep.subr.mxu1 %v84_v61  ;;  %910 = vmatpush3.msra.mxu0 %v36_v63  ;;  %v104_v34 = vld [vmem:[#allocation2 + $0x230] sm:$0xff]  ;;  %v103_v36 = vld [vmem:[#allocation2 + $0x228] sm:$0xff]  ;;  %v118_v37 = vld [vmem:[#allocation2 + $0x2a0] sm:$0xff]  ;;  %v1078_v61 = vand.u32 127, %v136_v32  ;;  %v386_v63 = vadd.s32 24, %v1060_v42 }
  0x2b   :  { %945 = vmatpush3.msra.mxu1 %v68_v0  ;;  %911 = vmatprep.subr.mxu0 %v51_v2  ;;  %v102_v38 = vld [vmem:[#allocation2 + $0x220] sm:$0xff]  ;;  %v117_v39 = vld [vmem:[#allocation2 + $0x298] sm:$0xff]  ;;  %v116_v41 = vld [vmem:[#allocation2 + $0x290] sm:$0xff]  ;;  %v1083_v0 = vsub.s32 0, %v1060_v42 }
  0x2c   :  { %946 = vmatprep.subr.mxu1 %v83_v3  ;;  %912 = vmatpush3.msra.mxu0 %v35_v4  ;;  %v101_v40 = vld [vmem:[#allocation2 + $0x218] sm:$0xff]  ;;  %v100_v43 = vld [vmem:[#allocation2 + $0x210] sm:$0xff]  ;;  %v115_v44 = vld [vmem:[#allocation2 + $0x288] sm:$0xff]  ;;  %v1086_v3 = vsub.s32 1, %v1060_v42  ;;  %vm387_vm1 = vcmp.eq.s32.totalorder %v1078_v61, %v386_v63 }
  0x2d   :  { %947 = vmatpush3.msra.mxu1 %v67_v5  ;;  %913 = vmatprep.subr.mxu0 %v50_v6  ;;  %v99_v45 = vld [vmem:[#allocation2 + $0x208] sm:$0xff]  ;;  %v114_v46 = vld [vmem:[#allocation2 + $0x280] sm:$0xff] }
  0x2e   :  { %948 = vmatprep.subr.mxu1 %v82_v7  ;;  %914 = vmatpush3.msra.mxu0 %v34_v9  ;;  %v98_v47 = vld [vmem:[#allocation2 + $0x200] sm:$0xff] }
  0x2f   :  { %227 = vmatprep.mubr.f32.mxu0 %v147_v8  ;;  %949 = vmatpush3.msra.mxu1 %v66_v11  ;;  %v880_v58 = vld [vmem:[%s1315_s3] ss:$0 sm:$0xff]  ;;  %v417_v8 = vmul.u32 8, %v1060_v42 }
  0x30   :  { %297 = vmatprep.mubr.f32.mxu1 %v148_v10  ;;  %228 = vmatmul.mubr.f32.vlgmr.msra.gmra.mxu0 %v139_v62  ;;  %v395_v62 = vmul.u32 3, %v1060_v42 }
  0x31   :  { %298 = vmatmul.mubr.f32.vlgmr.msra.gmra.mxu1 %v146_v1  ;;  %953 = vmatprep.subr.mxu0 %v129_v12  ;;  %v1104_v12 = vadd.s32 32, %v417_v8 }
  0x32   :  { %367 = vmatprep.mubr.f32.mxu0 %v156_v15  ;;  %954 = vmatpush3.msra.mxu0 %v113_v14  ;;  %vm396_vm0 = vcmp.eq.s32.totalorder %v1078_v61, %v395_v62  ;;  %v400_v4 = vadd.s32 1, %v395_v62  ;;  %v405_v11 = vadd.s32 2, %v395_v62  ;;  %v410_v15 = vadd.s32 56, %v1060_v42 }
  0x33   :  { %955 = vmatprep.subr.mxu0 %v128_v16  ;;  %vm419_vm4 = vcmp.eq.s32.totalorder %v1078_v61, %v1104_v12  ;;  %v424_v16 = vadd.s32 1, %v1104_v12 }
  0x34   :  { %956 = vmatpush3.msra.mxu0 %v112_v17  ;;  %vm401_vm2 = vcmp.eq.s32.totalorder %v1078_v61, %v400_v4  ;;  %vm406_vm3 = vcmp.eq.s32.totalorder %v1078_v61, %v405_v11  ;;  %vm411_vm6 = vcmp.eq.s32.totalorder %v1078_v61, %v410_v15  ;;  %v1195_v11 = vsub.s32 6, %v1060_v42 }
  0x35   :  { %957 = vmatprep.subr.mxu0 %v127_v18  ;;  %vm425_vm7 = vcmp.eq.s32.totalorder %v1078_v61, %v424_v16 }
  0x36   :  { %958 = vmatpush3.msra.mxu0 %v111_v19 }
  0x37   :  { %959 = vmatprep.subr.mxu0 %v126_v20 }
  0x38   :  { %960 = vmatpush3.msra.mxu0 %v110_v21 }
  0x39   :  { %961 = vmatprep.subr.mxu0 %v125_v22 }
  0x3a   :  { %962 = vmatpush3.msra.mxu0 %v109_v23 }
  0x3b   :  { %963 = vmatprep.subr.mxu0 %v124_v24 }
  0x3c   :  { %964 = vmatpush3.msra.mxu0 %v108_v25  ;;  %v430_v25 = vadd.s32 2, %v1104_v12 }
  0x3d   :  { %965 = vmatprep.subr.mxu0 %v123_v26 }
  0x3e   :  { %966 = vmatpush3.msra.mxu0 %v107_v27  ;;  %vm431_vm8 = vcmp.eq.s32.totalorder %v1078_v61, %v430_v25 }
  0x3f   :  { %967 = vmatprep.subr.mxu0 %v122_v28 }
  0x40   :  { %968 = vmatpush3.msra.mxu0 %v106_v29 }
  0x41   :  { %969 = vmatprep.subr.mxu0 %v121_v30  ;;  %v436_v30 = vadd.s32 3, %v1104_v12 }
  0x42   :  { %970 = vmatpush3.msra.mxu0 %v105_v31 }
  0x43   :  { %971 = vmatprep.subr.mxu0 %v120_v33  ;;  %vm437_vm9 = vcmp.eq.s32.totalorder %v1078_v61, %v436_v30 }
  0x44   :  { %972 = vmatpush3.msra.mxu0 %v104_v34 }
  0x45   :  { %973 = vmatprep.subr.mxu0 %v119_v35 }
  0x46   :  { %974 = vmatpush3.msra.mxu0 %v103_v36  ;;  %v442_v36 = vadd.s32 4, %v1104_v12 }
  0x47   :  { %975 = vmatprep.subr.mxu0 %v118_v37 }
  0x48   :  { %976 = vmatpush3.msra.mxu0 %v102_v38  ;;  %vm443_vm10 = vcmp.eq.s32.totalorder %v1078_v61, %v442_v36 }
  0x49   :  { %977 = vmatprep.subr.mxu0 %v117_v39 }
  0x4a   :  { %978 = vmatpush3.msra.mxu0 %v101_v40 }
  0x4b   :  { %979 = vmatprep.subr.mxu0 %v116_v41  ;;  %v448_v41 = vadd.s32 5, %v1104_v12 }
  0x4c   :  { %980 = vmatpush3.msra.mxu0 %v100_v43 }
  0x4d   :  { %981 = vmatprep.subr.mxu0 %v115_v44  ;;  %vm449_vm11 = vcmp.eq.s32.totalorder %v1078_v61, %v448_v41 }
  0x4e   :  { %982 = vmatpush3.msra.mxu0 %v99_v45 }
  0x4f   :  { %983 = vmatprep.subr.mxu0 %v114_v46 }
  0x50   :  { %984 = vmatpush3.msra.mxu0 %v98_v47  ;;  %v454_v47 = vadd.s32 6, %v1104_v12 }
  0x51   :  { %368 = vmatmul.mubr.f32.vlgmr.msra.gmra.mxu0 %v1069_v13 }
  0x52   :  { %vm455_vm12 = vcmp.eq.s32.totalorder %v1078_v61, %v454_v47 }
  0xf0   :  { %v915_v48 = vpop.f32.mrf.mxu0 }
  0xf1   :  { %v950_v49 = vpop.f32.mrf.mxu1 }
  0xf2   :  { %v916_v50 = vpop.f32.mrf.mxu0 }
  0xf3   :  { %v951_v51 = vpop.f32.mrf.mxu1  ;;  %v917_v52 = vadd.f32 %v916_v50, %v915_v48 }
  0xf4   :  { %v952_v53 = vadd.f32 %v951_v51, %v950_v49 }
  0xf6   :  { %v300_v56 = vadd.f32 %v952_v53, %v917_v52  ;;  %v460_v52 = vadd.s32 7, %v1104_v12 }
  0xf8   :  { %vm461_vm13 = vcmp.eq.s32.totalorder %v1078_v61, %v460_v52  ;;  %v1173_v61 = vld [vmem:[%s1313_s1] sm:$0x77] }
  0xf9   :  { %v471_v4 = vrot.slane %v1173_v61, %v1083_v0  ;;  %v493_v8 = vrot.slane %v1173_v61, %v1086_v3 }
 0x111   :  { %v985_v54 = vpop.f32.mrf.mxu0 }
 0x113   :  { %v986_v55 = vpop.f32.mrf.mxu0 }
 0x114   :  { %v987_v57 = vadd.f32 %v986_v55, %v985_v54 }
 0x116   :  { %v370_v59 = vadd.f32 %v987_v57, %v300_v56 }
 0x118   :  { %v379_v60 = vadd.f32 %v880_v58, %v370_v59 }
 0x11a   :  { %995 = vtanh.f32 %v379_v60 }
 0x127   :  { %v996_v1 = vpop.eup %995 }
 0x128   :  { %v381_v2 = vmul.f32 4.5, %v996_v1  ;;  %v1168_v1 = vsub.s32 4, %v1060_v42 }
 0x12a   :  { %v1091_v32 = vrot.slane %v381_v2, %v1083_v0  ;;  %v1094_v5 = vrot.slane %v381_v2, %v1086_v3  ;;  %v1176_v2 = vsub.s32 5, %v1060_v42 }
 0x12c   :  { %v397_v6 = vsel %vm396_vm0, %v1091_v32, 0.0  ;;  %v392_v7 = vsel %vm387_vm1, %v1091_v32, 0.0  ;;  %v650_v9 = vsel %vm396_vm0, %v1094_v5, 0.0  ;;  %v402_v10 = vsel %vm401_vm2, %v1091_v32, 0.0 }
 0x12d   :  { %398 = vadd.xlane.f32.xlu0 %v397_v6  ;;  %393 = vadd.xlane.f32.xlu1 %v392_v7  ;;  %v647_v13 = vsel %vm387_vm1, %v1094_v5, 0.0  ;;  %v653_v14 = vsel %vm401_vm2, %v1094_v5, 0.0  ;;  %v407_v17 = vsel %vm406_vm3, %v1091_v32, 0.0  ;;  %v656_v18 = vsel %vm406_vm3, %v1094_v5, 0.0 }
 0x12e   :  { %v420_v19 = vsel %vm419_vm4, %v1091_v32, 0.0  ;;  %v663_v20 = vsel %vm419_vm4, %v1094_v5, 0.0  ;;  %v412_v23 = vsel %vm411_vm6, %v1091_v32, 0.0  ;;  %v426_v24 = vsel %vm425_vm7, %v1091_v32, 0.0 }
 0x12f   :  { %v421_v21 = vsel %vm413_vm5, %v420_v19, 0.0  ;;  %v664_v22 = vsel %vm413_vm5, %v663_v20, 0.0  ;;  %v414_v26 = vsel %vm413_vm5, %v412_v23, 0.0  ;;  %v427_v27 = vsel %vm413_vm5, %v426_v24, 0.0 }
 0x130   :  { %v659_v28 = vsel %vm411_vm6, %v1094_v5, 0.0  ;;  %v667_v29 = vsel %vm425_vm7, %v1094_v5, 0.0  ;;  %v432_v34 = vsel %vm431_vm8, %v1091_v32, 0.0  ;;  %v671_v35 = vsel %vm431_vm8, %v1094_v5, 0.0 }
 0x131   :  { %651 = vadd.xlane.f32.xlu0 %v650_v9  ;;  %403 = vadd.xlane.f32.xlu1 %v402_v10  ;;  %v660_v31 = vsel %vm413_vm5, %v659_v28, 0.0  ;;  %v668_v33 = vsel %vm413_vm5, %v667_v29, 0.0  ;;  %v433_v37 = vsel %vm413_vm5, %v432_v34, 0.0  ;;  %v672_v38 = vsel %vm413_vm5, %v671_v35, 0.0 }
 0x132   :  { %v438_v39 = vsel %vm437_vm9, %v1091_v32, 0.0  ;;  %v675_v40 = vsel %vm437_vm9, %v1094_v5, 0.0  ;;  %v444_v45 = vsel %vm443_vm10, %v1091_v32, 0.0  ;;  %v679_v46 = vsel %vm443_vm10, %v1094_v5, 0.0 }
 0x133   :  { %v439_v43 = vsel %vm413_vm5, %v438_v39, 0.0  ;;  %v676_v44 = vsel %vm413_vm5, %v675_v40, 0.0  ;;  %v445_v48 = vsel %vm413_vm5, %v444_v45, 0.0  ;;  %v680_v49 = vsel %vm413_vm5, %v679_v46, 0.0 }
 0x134   :  { %v450_v50 = vsel %vm449_vm11, %v1091_v32, 0.0  ;;  %v683_v51 = vsel %vm449_vm11, %v1094_v5, 0.0  ;;  %v456_v55 = vsel %vm455_vm12, %v1091_v32, 0.0  ;;  %v687_v56 = vsel %vm455_vm12, %v1094_v5, 0.0 }
 0x135   :  { %648 = vadd.xlane.f32.xlu0 %v647_v13  ;;  %654 = vadd.xlane.f32.xlu1 %v653_v14  ;;  %v451_v53 = vsel %vm413_vm5, %v450_v50, 0.0  ;;  %v684_v54 = vsel %vm413_vm5, %v683_v51, 0.0  ;;  %v457_v57 = vsel %vm413_vm5, %v456_v55, 0.0  ;;  %v688_v58 = vsel %vm413_vm5, %v687_v56, 0.0 }
 0x136   :  { %v462_v59 = vsel %vm461_vm13, %v1091_v32, 0.0  ;;  %v691_v60 = vsel %vm461_vm13, %v1094_v5, 0.0  ;;  %v475_v32 = vrot.slane %v1173_v61, %v1168_v1  ;;  %v1185_v5 = vld [vmem:[%s1313_s1 + $0x8] sm:$0x77]  ;;  %v497_v9 = vrot.slane %v1173_v61, %v1176_v2 }
 0x137   :  { %v463_v62 = vsel %vm413_vm5, %v462_v59, 0.0  ;;  %v692_v63 = vsel %vm413_vm5, %v691_v60, 0.0  ;;  %v1192_v10 = vsub.s32 2, %v1060_v42  ;;  %v701_v12 = vrot.slane %v1185_v5, %v1083_v0 }
 0x138   :  { %v705_v13 = vrot.slane %v1185_v5, %v1168_v1  ;;  %v481_v14 = vrot.slane %v471_v4, %v1083_v0  ;;  %v485_v15 = vrot.slane %v475_v32, %v1083_v0  ;;  %v723_v16 = vrot.slane %v1185_v5, %v1086_v3 }
 0x139   :  { %408 = vadd.xlane.f32.xlu0 %v407_v17  ;;  %657 = vadd.xlane.f32.xlu1 %v656_v18  ;;  %v727_v17 = vrot.slane %v1185_v5, %v1176_v2  ;;  %v503_v19 = vrot.slane %v493_v8, %v1086_v3  ;;  %v507_v20 = vrot.slane %v497_v9, %v1086_v3 }
 0x13a   :  { %v519_v23 = vrot.slane %v1173_v61, %v1195_v11  ;;  %v711_v24 = vrot.slane %v701_v12, %v1083_v0  ;;  %v715_v25 = vrot.slane %v705_v13, %v1083_v0  ;;  %v733_v30 = vrot.slane %v723_v16, %v1086_v3 }
 0x13d   :  { %422 = vadd.xlane.f32.xlu0 %v421_v21  ;;  %665 = vadd.xlane.f32.xlu1 %v664_v22  ;;  %v515_v22 = vrot.slane %v1173_v61, %v1192_v10 }
 0x141   :  { %415 = vadd.xlane.f32.xlu0 %v414_v26  ;;  %428 = vadd.xlane.f32.xlu1 %v427_v27  ;;  %v745_v26 = vrot.slane %v1185_v5, %v1192_v10  ;;  %v749_v27 = vrot.slane %v1185_v5, %v1195_v11 }
 0x143   :  { %v755_v41 = vrot.slane %v745_v26, %v1192_v10 }
 0x145   :  { %661 = vadd.xlane.f32.xlu0 %v660_v31  ;;  %669 = vadd.xlane.f32.xlu1 %v668_v33  ;;  %v737_v31 = vrot.slane %v727_v17, %v1086_v3 }
 0x149   :  { %434 = vadd.xlane.f32.xlu0 %v433_v37  ;;  %673 = vadd.xlane.f32.xlu1 %v672_v38  ;;  %v525_v37 = vrot.slane %v515_v22, %v1192_v10  ;;  %v529_v38 = vrot.slane %v519_v23, %v1192_v10 }
 0x14d   :  { %440 = vadd.xlane.f32.xlu0 %v439_v43  ;;  %677 = vadd.xlane.f32.xlu1 %v676_v44  ;;  %v759_v43 = vrot.slane %v749_v27, %v1192_v10  ;;  %v574_v27 = vsub.s32 3, %v1060_v42 }
 0x151   :  { %446 = vadd.xlane.f32.xlu0 %v445_v48  ;;  %681 = vadd.xlane.f32.xlu1 %v680_v49 }
 0x155   :  { %452 = vadd.xlane.f32.xlu0 %v451_v53  ;;  %685 = vadd.xlane.f32.xlu1 %v684_v54 }
 0x159   :  { %458 = vadd.xlane.f32.xlu0 %v457_v57  ;;  %689 = vadd.xlane.f32.xlu1 %v688_v58 }
 0x15d   :  { %464 = vadd.xlane.f32.xlu0 %v463_v62  ;;  %693 = vadd.xlane.f32.xlu1 %v692_v63 }
 0x1b6   :  { %v399_v6 = vpop.xlane.xlu0 %398  ;;  %v394_v7 = vpop.xlane.xlu1 %393 }
 0x1b7   :  { %v486_v28 = vmul.f32 %v481_v14, %v399_v6  ;;  %v487_v29 = vmul.f32 %v485_v15, %v399_v6 }
 0x1b9   :  { %v488_v44 = vadd.f32 %v486_v28, %v394_v7  ;;  %v489_v45 = vadd.f32 %v487_v29, %v394_v7  ;;  %v1247_v28 = vsub.s32 7, %v1060_v42  ;;  %v632_v29 = vcombine.high %v1173_v61, %v1173_v61 }
 0x1ba   :  { %v652_v18 = vpop.xlane.xlu0 %651  ;;  %v404_v21 = vpop.xlane.xlu1 %403 }
 0x1bb   :  { %v508_v33 = vmul.f32 %v503_v19, %v404_v21  ;;  %v509_v34 = vmul.f32 %v507_v20, %v404_v21  ;;  %v716_v39 = vmul.f32 %v711_v24, %v652_v18  ;;  %v717_v40 = vmul.f32 %v715_v25, %v652_v18 }
 0x1bd   :  { %v510_v50 = vadd.f32 %v508_v33, %v488_v44  ;;  %v511_v51 = vadd.f32 %v509_v34, %v489_v45 }
 0x1be   :  { %v649_v35 = vpop.xlane.xlu0 %648  ;;  %v655_v36 = vpop.xlane.xlu1 %654 }
 0x1bf   :  { %v718_v46 = vadd.f32 %v716_v39, %v649_v35  ;;  %v719_v47 = vadd.f32 %v717_v40, %v649_v35  ;;  %v738_v48 = vmul.f32 %v733_v30, %v655_v36  ;;  %v739_v49 = vmul.f32 %v737_v31, %v655_v36 }
 0x1c1   :  { %v740_v58 = vadd.f32 %v738_v48, %v718_v46  ;;  %v741_v59 = vadd.f32 %v739_v49, %v719_v47 }
 0x1c2   :  { %v409_v52 = vpop.xlane.xlu0 %408  ;;  %v658_v53 = vpop.xlane.xlu1 %657 }
 0x1c3   :  { %v530_v54 = vmul.f32 %v525_v37, %v409_v52  ;;  %v531_v55 = vmul.f32 %v529_v38, %v409_v52  ;;  %v760_v56 = vmul.f32 %v755_v41, %v658_v53  ;;  %v761_v57 = vmul.f32 %v759_v43, %v658_v53 }
 0x1c5   :  { %v532_v60 = vadd.f32 %v530_v54, %v510_v50  ;;  %v533_v62 = vadd.f32 %v531_v55, %v511_v51  ;;  %v762_v32 = vadd.f32 %v760_v56, %v740_v58  ;;  %v763_v6 = vadd.f32 %v761_v57, %v741_v59 }
 0x1c6   :  { %v423_v63 = vpop.xlane.xlu0 %422  ;;  %v666_v4 = vpop.xlane.xlu1 %665 }
 0x1c7   :  { %v1225_v7 = vmax.f32 %v532_v60, 0.0  ;;  %v1227_v8 = vmax.f32 %v533_v62, 0.0  ;;  %v1229_v13 = vmax.f32 %v762_v32, 0.0  ;;  %v1231_v14 = vmax.f32 %v763_v6, 0.0 }
 0x1c9   :  { %v539_v15 = vrot.slane %v1225_v7, %v1083_v0  ;;  %v543_v16 = vrot.slane %v1227_v8, %v1083_v0  ;;  %v769_v19 = vrot.slane %v1229_v13, %v1083_v0  ;;  %v773_v20 = vrot.slane %v1231_v14, %v1083_v0 }
 0x1ca   :  { %v416_v9 = vpop.xlane.xlu0 %415  ;;  %v429_v12 = vpop.xlane.xlu1 %428  ;;  %v551_v23 = vrot.slane %v1225_v7, %v1086_v3  ;;  %v555_v24 = vrot.slane %v1227_v8, %v1086_v3  ;;  %v781_v31 = vrot.slane %v1229_v13, %v1086_v3  ;;  %v785_v33 = vrot.slane %v1231_v14, %v1086_v3 }
 0x1cb   :  { %v544_v21 = vmul.f32 %v539_v15, %v423_v63  ;;  %v545_v22 = vmul.f32 %v543_v16, %v423_v63  ;;  %v774_v30 = vmul.f32 %v769_v19, %v666_v4  ;;  %v775_v0 = vmul.f32 %v773_v20, %v666_v4 }
 0x1cc   :  { %v556_v36 = vmul.f32 %v551_v23, %v429_v12  ;;  %v557_v37 = vmul.f32 %v555_v24, %v429_v12  ;;  %v563_v38 = vrot.slane %v1225_v7, %v1192_v10  ;;  %v567_v42 = vrot.slane %v1227_v8, %v1192_v10 }
 0x1cd   :  { %v546_v34 = vadd.f32 %v544_v21, %v416_v9  ;;  %v547_v35 = vadd.f32 %v545_v22, %v416_v9  ;;  %v793_v39 = vrot.slane %v1229_v13, %v1192_v10  ;;  %v797_v40 = vrot.slane %v1231_v14, %v1192_v10 }
 0x1ce   :  { %v662_v17 = vpop.xlane.xlu0 %661  ;;  %v670_v18 = vpop.xlane.xlu1 %669  ;;  %v575_v47 = vrot.slane %v1225_v7, %v574_v27  ;;  %v579_v48 = vrot.slane %v1227_v8, %v574_v27  ;;  %v805_v49 = vrot.slane %v1229_v13, %v574_v27  ;;  %v809_v50 = vrot.slane %v1231_v14, %v574_v27 }
 0x1cf   :  { %v776_v41 = vadd.f32 %v774_v30, %v662_v17  ;;  %v777_v43 = vadd.f32 %v775_v0, %v662_v17  ;;  %v786_v44 = vmul.f32 %v781_v31, %v670_v18  ;;  %v787_v3 = vmul.f32 %v785_v33, %v670_v18 }
 0x1d0   :  { %v558_v51 = vadd.f32 %v556_v36, %v546_v34  ;;  %v559_v52 = vadd.f32 %v557_v37, %v547_v35  ;;  %v587_v53 = vrot.slane %v1225_v7, %v1168_v1  ;;  %v591_v10 = vrot.slane %v1227_v8, %v1168_v1 }
 0x1d1   :  { %v788_v58 = vadd.f32 %v786_v44, %v776_v41  ;;  %v789_v59 = vadd.f32 %v787_v3, %v777_v43  ;;  %v817_v62 = vrot.slane %v1229_v13, %v1168_v1  ;;  %v821_v63 = vrot.slane %v1231_v14, %v1168_v1 }
 0x1d2   :  { %v435_v25 = vpop.xlane.xlu0 %434  ;;  %v674_v26 = vpop.xlane.xlu1 %673  ;;  %v599_v15 = vrot.slane %v1225_v7, %v1176_v2  ;;  %v603_v16 = vrot.slane %v1227_v8, %v1176_v2  ;;  %v829_v17 = vrot.slane %v1229_v13, %v1176_v2  ;;  %v833_v18 = vrot.slane %v1231_v14, %v1176_v2 }
 0x1d3   :  { %v568_v54 = vmul.f32 %v563_v38, %v435_v25  ;;  %v569_v55 = vmul.f32 %v567_v42, %v435_v25  ;;  %v798_v56 = vmul.f32 %v793_v39, %v674_v26  ;;  %v799_v57 = vmul.f32 %v797_v40, %v674_v26 }
 0x1d4   :  { %v611_v2 = vrot.slane %v1225_v7, %v1195_v11  ;;  %v615_v38 = vrot.slane %v1227_v8, %v1195_v11  ;;  %v841_v42 = vrot.slane %v1229_v13, %v1195_v11  ;;  %v845_v39 = vrot.slane %v1231_v14, %v1195_v11 }
 0x1d5   :  { %v570_v19 = vadd.f32 %v568_v54, %v558_v51  ;;  %v571_v20 = vadd.f32 %v569_v55, %v559_v52  ;;  %v800_v1 = vadd.f32 %v798_v56, %v788_v58  ;;  %v801_v21 = vadd.f32 %v799_v57, %v789_v59 }
 0x1d6   :  { %v441_v45 = vpop.xlane.xlu0 %440  ;;  %v678_v46 = vpop.xlane.xlu1 %677  ;;  %v627_v11 = vrot.slane %v1227_v8, %v1247_v28  ;;  %v853_v54 = vrot.slane %v1229_v13, %v1247_v28  ;;  %v857_v55 = vrot.slane %v1231_v14, %v1247_v28 }
 0x1d7   :  { %v580_v32 = vmul.f32 %v575_v47, %v441_v45  ;;  %v581_v6 = vmul.f32 %v579_v48, %v441_v45  ;;  %v810_v9 = vmul.f32 %v805_v49, %v678_v46  ;;  %v811_v12 = vmul.f32 %v809_v50, %v678_v46 }
 0x1d9   :  { %v582_v30 = vadd.f32 %v580_v32, %v570_v19  ;;  %v583_v0 = vadd.f32 %v581_v6, %v571_v20  ;;  %v812_v31 = vadd.f32 %v810_v9, %v800_v1  ;;  %v813_v33 = vadd.f32 %v811_v12, %v801_v21 }
 0x1da   :  { %v447_v60 = vpop.xlane.xlu0 %446  ;;  %v682_v4 = vpop.xlane.xlu1 %681 }
 0x1db   :  { %v592_v22 = vmul.f32 %v587_v53, %v447_v60  ;;  %v593_v23 = vmul.f32 %v591_v10, %v447_v60  ;;  %v822_v24 = vmul.f32 %v817_v62, %v682_v4  ;;  %v823_v25 = vmul.f32 %v821_v63, %v682_v4 }
 0x1dc   :  { %v623_v10 = vrot.slane %v1225_v7, %v1247_v28  ;;  %v862_v7 = vcombine.high %v1185_v5, %v1185_v5 }
 0x1dd   :  { %v594_v40 = vadd.f32 %v592_v22, %v582_v30  ;;  %v595_v41 = vadd.f32 %v593_v23, %v583_v0  ;;  %v824_v43 = vadd.f32 %v822_v24, %v812_v31  ;;  %v825_v44 = vadd.f32 %v823_v25, %v813_v33 }
 0x1de   :  { %v453_v26 = vpop.xlane.xlu0 %452  ;;  %v686_v27 = vpop.xlane.xlu1 %685 }
 0x1df   :  { %v604_v34 = vmul.f32 %v599_v15, %v453_v26  ;;  %v605_v35 = vmul.f32 %v603_v16, %v453_v26  ;;  %v834_v36 = vmul.f32 %v829_v17, %v686_v27  ;;  %v835_v37 = vmul.f32 %v833_v18, %v686_v27 }
 0x1e1   :  { %v606_v50 = vadd.f32 %v604_v34, %v594_v40  ;;  %v607_v51 = vadd.f32 %v605_v35, %v595_v41  ;;  %v836_v52 = vadd.f32 %v834_v36, %v824_v43  ;;  %v837_v53 = vadd.f32 %v835_v37, %v825_v44 }
 0x1e2   :  { %v459_v3 = vpop.xlane.xlu0 %458  ;;  %v690_v45 = vpop.xlane.xlu1 %689 }
 0x1e3   :  { %v616_v46 = vmul.f32 %v611_v2, %v459_v3  ;;  %v617_v47 = vmul.f32 %v615_v38, %v459_v3  ;;  %v846_v48 = vmul.f32 %v841_v42, %v690_v45  ;;  %v847_v49 = vmul.f32 %v845_v39, %v690_v45 }
 0x1e5   :  { %v618_v56 = vadd.f32 %v616_v46, %v606_v50  ;;  %v619_v57 = vadd.f32 %v617_v47, %v607_v51  ;;  %v848_v58 = vadd.f32 %v846_v48, %v836_v52  ;;  %v849_v59 = vadd.f32 %v847_v49, %v837_v53 }
 0x1e6   :  { %v465_v60 = vpop.xlane.xlu0 %464  ;;  %v694_v62 = vpop.xlane.xlu1 %693 }
 0x1e7   :  { %v628_v63 = vmul.f32 %v623_v10, %v465_v60  ;;  %v629_v4 = vmul.f32 %v627_v11, %v465_v60  ;;  %v858_v32 = vmul.f32 %v853_v54, %v694_v62  ;;  %v859_v6 = vmul.f32 %v857_v55, %v694_v62 }
 0x1e9   :  { %v630_v8 = vadd.f32 %v628_v63, %v618_v56  ;;  %v631_v9 = vadd.f32 %v629_v4, %v619_v57  ;;  %v860_v12 = vadd.f32 %v858_v32, %v848_v58  ;;  %v861_v13 = vadd.f32 %v859_v6, %v849_v59 }
 0x1eb   :  { %v634_v15 = vadd.f32 %v630_v8, %v1173_v61  ;;  %v635_v14 = vadd.f32 %v632_v29, %v631_v9  ;;  %v864_v28 = vadd.f32 %v1185_v5, %v860_v12  ;;  %v865_v16 = vadd.f32 %v862_v7, %v861_v13 }
 0x1ed   :  { %997 = vtanh.f32 %v634_v15 }
 0x1ee   :  { %999 = vtanh.f32 %v635_v14 }
 0x1ef   :  { %1001 = vtanh.f32 %v864_v28 }
 0x1f0   :  { %1003 = vtanh.f32 %v865_v16 }
 0x1fa   :  { %v998_v17 = vpop.eup %997 }
 0x1fb   :  { %v1000_v18 = vpop.eup %999 }
 0x1fc   :  { %v1002_v19 = vpop.eup %1001  ;;  %v640_v20 = vcombine.low %v998_v17, %v1000_v18 }
 0x1fd   :  { %v1004_v1 = vpop.eup %1003 }
 0x1fe   :  { %642 = vst [vmem:[%s1316_s4] sm:$0x77] %v640_v20  ;;  %v870_v21 = vcombine.low %v1002_v19, %v1004_v1 }
 0x200   :  { %882 = vst [vmem:[%s1316_s4 + $0x8] sm:$0x77] %v870_v21 }
 0x201   :  { %878 = vsyncpa [#allocation3], 1 }

</bundles_post_ra>
